<compile_context>
chip_gen: v6e
topology: v6e:2x2x1
jax: 0.10.0
libtpu: 0.0.40
codegen_flags: <defaults>
</compile_context>

<pallas_src>
import functools
import math

import jax
import jax.numpy as jnp
from jax.experimental import pallas as pl
from jax.experimental.pallas import tpu as pltpu

# ---------------- synthetic config ----------------
BATCH = 2
SEQ = 8
HIDDEN = 128                 # lane-dense (multiple of 128)
NUM_HEADS = 4
HEAD_DIM = HIDDEN // NUM_HEADS
INTERMEDIATE = 512
I_TILE = 128                 # FFN intermediate streamed in I_TILE-wide slices
NUM_LAYERS = 2
LN_EPS = 1e-5

# rows of the packed per-layer "small vector" array
VEC_W = max(3 * HIDDEN, INTERMEDIATE)
_ROW_BQKV, _ROW_B1, _ROW_BO, _ROW_B2 = 0, 1, 2, 3
_ROW_LN1G, _ROW_LN1B, _ROW_LN2G, _ROW_LN2B = 4, 5, 6, 7
_NUM_VEC_ROWS = 8


def _layer_norm(x, gamma, beta):
  mu = jnp.mean(x, axis=-1, keepdims=True)
  var = jnp.mean((x - mu) ** 2, axis=-1, keepdims=True)
  return (x - mu) * jax.lax.rsqrt(var + LN_EPS) * gamma + beta


def _gelu_exact(x):
  # torch.nn.functional.gelu default = exact (erf-based) GELU
  return 0.5 * x * (1.0 + jax.lax.erf(x * (1.0 / math.sqrt(2.0))))


# ---------------- fused whole-encoder kernel ----------------
def encoder_kernel(x_ref, wqkv_ref, wo_ref, w1_ref, w2_ref, vec_ref, fin_ref,
                   out_ref, h1_ref, acc_ref,
                   *, seq, num_heads, head_dim, i_tile):
  """grid = (batch, layer, i_tile); residual stream lives in out_ref."""
  layer = pl.program_id(1)
  kt = pl.program_id(2)
  last_layer = pl.num_programs(1) - 1
  last_kt = pl.num_programs(2) - 1
  hidden = num_heads * head_dim

  # Load this batch block's input into the resident residual (out_ref) once.
  @pl.when(jnp.logical_and(layer == 0, kt == 0))
  def _():
    out_ref[...] = x_ref[...].astype(jnp.float32)

  ln2_g = vec_ref[_ROW_LN2G:_ROW_LN2G + 1, :hidden]
  ln2_b = vec_ref[_ROW_LN2B:_ROW_LN2B + 1, :hidden]

  # ---- attention block: only at the first intermediate tile of each layer ----
  @pl.when(kt == 0)
  def _():
    h = out_ref[...]                                   # (T, H) f32 residual
    ln1_g = vec_ref[_ROW_LN1G:_ROW_LN1G + 1, :hidden]
    ln1_b = vec_ref[_ROW_LN1B:_ROW_LN1B + 1, :hidden]
    bqkv = vec_ref[_ROW_BQKV:_ROW_BQKV + 1, :3 * hidden]
    bo = vec_ref[_ROW_BO:_ROW_BO + 1, :hidden]

    xn = _layer_norm(h, ln1_g, ln1_b)
    qkv = jnp.dot(xn.astype(jnp.bfloat16), wqkv_ref[...],
                  preferred_element_type=jnp.float32) + bqkv   # (T, 3H)
    # 1/sqrt(head_dim) already folded into the Q columns of Wqkv (+ bias).
    q = qkv[:, :hidden].reshape(seq, num_heads, head_dim).astype(jnp.bfloat16)
    k = qkv[:, hidden:2 * hidden].reshape(
        seq, num_heads, head_dim).astype(jnp.bfloat16)
    v = qkv[:, 2 * hidden:].reshape(
        seq, num_heads, head_dim).astype(jnp.bfloat16)

    s = jnp.einsum('qhd,khd->hqk', q, k,
                   preferred_element_type=jnp.float32)         # (nh, T, T)
    s = s - jnp.max(s, axis=-1, keepdims=True)
    p = jnp.exp(s)
    p = p * pl.reciprocal(jnp.sum(p, axis=-1, keepdims=True), approx=False)
    o = jnp.einsum('hqk,khd->qhd', p.astype(jnp.bfloat16), v,
                   preferred_element_type=jnp.float32).reshape(seq, hidden)

    attn = jnp.dot(o.astype(jnp.bfloat16), wo_ref[...],
                   preferred_element_type=jnp.float32) + bo
    h1_ref[...] = h + attn                             # residual 1
    acc_ref[...] = jnp.zeros_like(acc_ref)             # FFN accumulator

  # ---- feed-forward: one INTERMEDIATE tile per grid step (weights streamed) --
  h1n = _layer_norm(h1_ref[...], ln2_g, ln2_b)
  i0 = pl.multiple_of(kt * i_tile, i_tile)
  b1_t = vec_ref[_ROW_B1:_ROW_B1 + 1, pl.ds(i0, i_tile)]       # (1, I_TILE)
  ff = jnp.dot(h1n.astype(jnp.bfloat16), w1_ref[...],
               preferred_element_type=jnp.float32) + b1_t
  ff = _gelu_exact(ff)
  acc_ref[...] += jnp.dot(ff.astype(jnp.bfloat16), w2_ref[...],
                          preferred_element_type=jnp.float32)

  # ---- finish the layer: residual 2 written back into out_ref ----
  @pl.when(kt == last_kt)
  def _():
    b2 = vec_ref[_ROW_B2:_ROW_B2 + 1, :hidden]
    out_ref[...] = h1_ref[...] + acc_ref[...] + b2

  # ---- final encoder LayerNorm as an epilogue of the last layer ----
  @pl.when(jnp.logical_and(layer == last_layer, kt == last_kt))
  def _():
    out_ref[...] = _layer_norm(out_ref[...], fin_ref[0:1, :],
                               fin_ref[1:2, :]).astype(out_ref.dtype)


# ---------------- wrapper ----------------
def wav2vec2_encoder_stable_layer_norm(x, wqkv, wo, w1, w2, vecs, fin):
  """x: (B, T, H) f32. Stacked bf16 weights (leading layer axis) + packed vecs."""
  B, T, H = x.shape
  L = wqkv.shape[0]
  I = w1.shape[2]
  n_kt = I // I_TILE
  xf = x.reshape(B * T, H)

  kernel = functools.partial(
      encoder_kernel, seq=T, num_heads=NUM_HEADS, head_dim=HEAD_DIM,
      i_tile=I_TILE)

  out = pl.pallas_call(
      kernel,
      out_shape=jax.ShapeDtypeStruct((B * T, H), x.dtype),
      grid_spec=pltpu.PrefetchScalarGridSpec(
          num_scalar_prefetch=0,
          grid=(B, L, n_kt),
          in_specs=[
              pl.BlockSpec((T, H), lambda b, l, t: (b, 0)),                # x
              pl.BlockSpec((None, H, 3 * H), lambda b, l, t: (l, 0, 0)),   # Wqkv
              pl.BlockSpec((None, H, H), lambda b, l, t: (l, 0, 0)),       # Wo
              pl.BlockSpec((None, H, I_TILE), lambda b, l, t: (l, 0, t)),  # W1 tile
              pl.BlockSpec((None, I_TILE, H), lambda b, l, t: (l, t, 0)),  # W2 tile
              pl.BlockSpec((None, _NUM_VEC_ROWS, VEC_W),
                           lambda b, l, t: (l, 0, 0)),                     # packed vecs
              pl.BlockSpec((2, H), lambda b, l, t: (0, 0)),                # final LN
          ],
          # residual stream lives here: block index constant across (l, t)
          out_specs=pl.BlockSpec((T, H), lambda b, l, t: (b, 0)),
          scratch_shapes=[
              pltpu.VMEM((T, H), jnp.float32),   # h1 (post-attention residual)
              pltpu.VMEM((T, H), jnp.float32),   # FFN output accumulator
          ],
      ),
      compiler_params=pltpu.CompilerParams(
          # batch is independent (-> both TCs on v7x); layer & i-tile axes are
          # sequential dependencies.
          dimension_semantics=("parallel", "arbitrary", "arbitrary"),
          # explicit scoped-VMEM budget: resident (T,H) activations + two
          # double-buffered weight tiles (size to the realistic config; the
          # 16/32 MiB defaults are the first thing hit at H=1024, I=4096).
          vmem_limit_bytes=48 * 1024 * 1024,
      ),
  )(xf, wqkv, wo, w1, w2, vecs, fin)
  return out.reshape(B, T, H)


# ---------------- parameter init (deterministic, synthetic) ----------------
def init_params(key):
  layer_keys = jax.random.split(key, NUM_LAYERS)
  wqkv_l, wo_l, w1_l, w2_l, vec_l, ref_l = [], [], [], [], [], []
  scale = HEAD_DIM ** (-0.5)

  def lin(k, fi, fo):
    w = jax.random.normal(k, (fi, fo), jnp.float32) * 0.05
    b = jnp.full((fo,), 0.01, jnp.float32)
    return w, b

  def pad_row(v):
    return jnp.pad(v, (0, VEC_W - v.shape[0]))

  for lk in layer_keys:
    ks = jax.random.split(lk, 10)
    wq, bq = lin(ks[0], HIDDEN, HIDDEN)
    wk, bk = lin(ks[1], HIDDEN, HIDDEN)
    wv, bv = lin(ks[2], HIDDEN, HIDDEN)
    wo, bo = lin(ks[3], HIDDEN, HIDDEN)
    w1, b1 = lin(ks[4], HIDDEN, INTERMEDIATE)
    w2, b2 = lin(ks[5], INTERMEDIATE, HIDDEN)
    ln1_g = 1.0 + 0.1 * jax.random.normal(ks[6], (HIDDEN,), jnp.float32)
    ln1_b = 0.05 * jax.random.normal(ks[7], (HIDDEN,), jnp.float32)
    ln2_g = 1.0 + 0.1 * jax.random.normal(ks[8], (HIDDEN,), jnp.float32)
    ln2_b = 0.05 * jax.random.normal(ks[9], (HIDDEN,), jnp.float32)

    # fold the SDPA 1/sqrt(head_dim) scale into the Q projection
    wqkv_l.append(jnp.concatenate([wq * scale, wk, wv], axis=1))   # (H, 3H)
    wo_l.append(wo)
    w1_l.append(w1)
    w2_l.append(w2)
    vec_l.append(jnp.stack([
        pad_row(jnp.concatenate([bq * scale, bk, bv])), pad_row(b1),
        pad_row(bo), pad_row(b2),
        pad_row(ln1_g), pad_row(ln1_b), pad_row(ln2_g), pad_row(ln2_b)]))
    ref_l.append((ln1_g, ln1_b, wq, bq, wk, bk, wv, bv, wo, bo,
                  ln2_g, ln2_b, w1, b1, w2, b2))

  packs = (jnp.stack(wqkv_l).astype(jnp.bfloat16),   # bf16 weights in HBM
           jnp.stack(wo_l).astype(jnp.bfloat16),
           jnp.stack(w1_l).astype(jnp.bfloat16),
           jnp.stack(w2_l).astype(jnp.bfloat16),
           jnp.stack(vec_l))                         # small params stay f32
  return packs, ref_l


# ---------------- pure-JAX reference (for sanity check) ----------------
def ref_layer(h, p):
  (ln1_g, ln1_b, wq, bq, wk, bk, wv, bv, wo, bo,
   ln2_g, ln2_b, w1, b1, w2, b2) = p
  B, T, H = h.shape
  xn = _layer_norm(h, ln1_g, ln1_b)
  q = (xn @ wq + bq).reshape(B, T, NUM_HEADS, HEAD_DIM)
  k = (xn @ wk + bk).reshape(B, T, NUM_HEADS, HEAD_DIM)
  v = (xn @ wv + bv).reshape(B, T, NUM_HEADS, HEAD_DIM)
  s = jnp.einsum('bqhd,bkhd->bhqk', q, k) / math.sqrt(HEAD_DIM)
  pw = jax.nn.softmax(s, axis=-1)
  o = jnp.einsum('bhqk,bkhd->bqhd', pw, v).reshape(B, T, H)
  h1 = h + (o @ wo + bo)
  ff = _gelu_exact(_layer_norm(h1, ln2_g, ln2_b) @ w1 + b1) @ w2 + b2
  return h1 + ff


def ref_encoder(h, layer_params, fin_g, fin_b):
  for p in layer_params:
    h = ref_layer(h, p)
  return _layer_norm(h, fin_g, fin_b)


if __name__ == "__main__":
  key = jax.random.PRNGKey(0)
  k_x, k_p, k_fg, k_fb = jax.random.split(key, 4)

  x = jax.random.normal(k_x, (BATCH, SEQ, HIDDEN), jnp.float32)
  (wqkv, wo, w1, w2, vecs), ref_params = init_params(k_p)
  fin_g = 1.0 + 0.1 * jax.random.normal(k_fg, (HIDDEN,), jnp.float32)
  fin_b = 0.05 * jax.random.normal(k_fb, (HIDDEN,), jnp.float32)
  fin = jnp.stack([fin_g, fin_b])                   # (2, H) f32

  out = wav2vec2_encoder_stable_layer_norm(x, wqkv, wo, w1, w2, vecs, fin)
  out = jax.block_until_ready(out)

  ref = ref_encoder(x, ref_params, fin_g, fin_b)    # full-f32 reference
  assert out.shape == (BATCH, SEQ, HIDDEN)
  max_err = float(jnp.max(jnp.abs(out - ref)))
  # bf16 matmul operands vs the full-f32 reference -> loosened tolerance.
  assert jnp.allclose(out, ref, atol=3e-2, rtol=3e-2), f"mismatch: {max_err}"

  print("KERNEL_OK")
</pallas_src>

<mosaic_0001>
module attributes {stable_mosaic.version = 11 : i64} {
  func.func @encoder_kernel(%arg0: i32, %arg1: i32, %arg2: i32, %arg3: memref<8x128xf32, #tpu.memory_space<vmem>>, %arg4: memref<1x128x384xbf16, #tpu.memory_space<vmem>>, %arg5: memref<1x128x128xbf16, #tpu.memory_space<vmem>>, %arg6: memref<1x128x128xbf16, #tpu.memory_space<vmem>>, %arg7: memref<1x128x128xbf16, #tpu.memory_space<vmem>>, %arg8: memref<1x8x512xf32, #tpu.memory_space<vmem>>, %arg9: memref<2x128xf32, #tpu.memory_space<vmem>>, %arg10: memref<8x128xf32, #tpu.memory_space<vmem>>, %arg11: memref<8x128xf32, #tpu.memory_space<vmem>>, %arg12: memref<8x128xf32, #tpu.memory_space<vmem>>) attributes {dimension_semantics = [#tpu.dimension_semantics<parallel>, #tpu.dimension_semantics<arbitrary>, #tpu.dimension_semantics<arbitrary>], iteration_bounds = array<i64: 2, 2, 4>, scalar_prefetch = 0 : i64, scratch_operands = 2 : i64, tpu.core_type = #tpu.core_type<tc>, window_params = [{transform_indices = @transform_0, window_bounds = array<i64: 8, 128>}, {transform_indices = @transform_1, window_bounds = array<i64: 1, 128, 384>}, {transform_indices = @transform_2, window_bounds = array<i64: 1, 128, 128>}, {transform_indices = @transform_3, window_bounds = array<i64: 1, 128, 128>}, {transform_indices = @transform_4, window_bounds = array<i64: 1, 128, 128>}, {transform_indices = @transform_5, window_bounds = array<i64: 1, 8, 512>}, {pipeline_mode = #tpu.pipeline_mode<synchronous>, transform_indices = @transform_6, window_bounds = array<i64: 2, 128>}, {transform_indices = @transform_7, window_bounds = array<i64: 8, 128>}]} {
    %c0_i32 = arith.constant 0 : i32
    %0 = arith.cmpi eq, %arg1, %c0_i32 : i32
    %c0_i32_0 = arith.constant 0 : i32
    %1 = arith.cmpi eq, %arg2, %c0_i32_0 : i32
    %2 = arith.andi %0, %1 : i1
    %3 = arith.extui %2 : i1 to i32
    %c0_i32_1 = arith.constant 0 : i32
    %4 = arith.cmpi ne, %3, %c0_i32_1 : i32
    scf.if %4 {
      %c0_32 = arith.constant 0 : index
      %c0_33 = arith.constant 0 : index
      %69 = vector.load %arg3[%c0_32, %c0_33] : memref<8x128xf32, #tpu.memory_space<vmem>>, vector<8x128xf32>
      %c0_34 = arith.constant 0 : index
      %c0_35 = arith.constant 0 : index
      %70 = vector.load %arg10[%c0_34, %c0_35] : memref<8x128xf32, #tpu.memory_space<vmem>>, vector<8x128xf32>
      tpu.vector_store %arg10[%c0_34, %c0_35], %69 {strides = array<i32>} : memref<8x128xf32, #tpu.memory_space<vmem>>, vector<8x128xf32>,
    } else {
    }
    %c0 = arith.constant 0 : index
    %c6 = arith.constant 6 : index
    %c0_2 = arith.constant 0 : index
    %5 = vector.load %arg8[%c0, %c6, %c0_2] : memref<1x8x512xf32, #tpu.memory_space<vmem>>, vector<1x1x128xf32>
    %6 = vector.shape_cast %5 : vector<1x1x128xf32> to vector<1x128xf32>
    %c0_3 = arith.constant 0 : index
    %c7 = arith.constant 7 : index
    %c0_4 = arith.constant 0 : index
    %7 = vector.load %arg8[%c0_3, %c7, %c0_4] : memref<1x8x512xf32, #tpu.memory_space<vmem>>, vector<1x1x128xf32>
    %8 = vector.shape_cast %7 : vector<1x1x128xf32> to vector<1x128xf32>
    %c0_i32_5 = arith.constant 0 : i32
    %9 = arith.cmpi eq, %arg2, %c0_i32_5 : i32
    %10 = arith.extui %9 : i1 to i32
    %c0_i32_6 = arith.constant 0 : i32
    %11 = arith.cmpi ne, %10, %c0_i32_6 : i32
    scf.if %11 {
      %c0_32 = arith.constant 0 : index
      %c0_33 = arith.constant 0 : index
      %69 = vector.load %arg10[%c0_32, %c0_33] : memref<8x128xf32, #tpu.memory_space<vmem>>, vector<8x128xf32>
      %c0_34 = arith.constant 0 : index
      %c4 = arith.constant 4 : index
      %c0_35 = arith.constant 0 : index
      %70 = vector.load %arg8[%c0_34, %c4, %c0_35] : memref<1x8x512xf32, #tpu.memory_space<vmem>>, vector<1x1x128xf32>
      %71 = vector.shape_cast %70 : vector<1x1x128xf32> to vector<1x128xf32>
      %c0_36 = arith.constant 0 : index
      %c5 = arith.constant 5 : index
      %c0_37 = arith.constant 0 : index
      %72 = vector.load %arg8[%c0_36, %c5, %c0_37] : memref<1x8x512xf32, #tpu.memory_space<vmem>>, vector<1x1x128xf32>
      %73 = vector.shape_cast %72 : vector<1x1x128xf32> to vector<1x128xf32>
      %c0_38 = arith.constant 0 : index
      %c0_39 = arith.constant 0 : index
      %c0_40 = arith.constant 0 : index
      %74 = vector.load %arg8[%c0_38, %c0_39, %c0_40] : memref<1x8x512xf32, #tpu.memory_space<vmem>>, vector<1x1x384xf32>
      %75 = vector.shape_cast %74 : vector<1x1x384xf32> to vector<1x384xf32>
      %c0_41 = arith.constant 0 : index
      %c2 = arith.constant 2 : index
      %c0_42 = arith.constant 0 : index
      %76 = vector.load %arg8[%c0_41, %c2, %c0_42] : memref<1x8x512xf32, #tpu.memory_space<vmem>>, vector<1x1x128xf32>
      %77 = vector.shape_cast %76 : vector<1x1x128xf32> to vector<1x128xf32>
      %cst_43 = arith.constant dense<0.000000e+00> : vector<8xf32>
      %78 = vector.multi_reduction <add>, %69, %cst_43 [1] : vector<8x128xf32> to vector<8xf32>
      %79 = vector.shape_cast %78 : vector<8xf32> to vector<8x1xf32>
      %cst_44 = arith.constant 1.280000e+02 : f32
      %80 = vector.broadcast %cst_44 : f32 to vector<8x1xf32>
      %81 = arith.divf %79, %80 : vector<8x1xf32>
      %82 = vector.broadcast %81 : vector<8x1xf32> to vector<8x128xf32>
      %83 = arith.subf %69, %82 : vector<8x128xf32>
      %84 = arith.mulf %83, %83 : vector<8x128xf32>
      %cst_45 = arith.constant dense<0.000000e+00> : vector<8xf32>
      %85 = vector.multi_reduction <add>, %84, %cst_45 [1] : vector<8x128xf32> to vector<8xf32>
      %86 = vector.shape_cast %85 : vector<8xf32> to vector<8x1xf32>
      %cst_46 = arith.constant 1.280000e+02 : f32
      %87 = vector.broadcast %cst_46 : f32 to vector<8x1xf32>
      %88 = arith.divf %86, %87 : vector<8x1xf32>
      %89 = vector.broadcast %81 : vector<8x1xf32> to vector<8x128xf32>
      %90 = arith.subf %69, %89 : vector<8x128xf32>
      %cst_47 = arith.constant 9.99999974E-6 : f32
      %91 = vector.broadcast %cst_47 : f32 to vector<8x1xf32>
      %92 = arith.addf %88, %91 : vector<8x1xf32>
      %93 = math.rsqrt %92 : vector<8x1xf32>
      %94 = vector.broadcast %93 : vector<8x1xf32> to vector<8x128xf32>
      %95 = arith.mulf %90, %94 : vector<8x128xf32>
      %96 = vector.broadcast %71 : vector<1x128xf32> to vector<8x128xf32>
      %97 = arith.mulf %95, %96 : vector<8x128xf32>
      %98 = vector.broadcast %73 : vector<1x128xf32> to vector<8x128xf32>
      %99 = arith.addf %97, %98 : vector<8x128xf32>
      %100 = arith.truncf %99 : vector<8x128xf32> to vector<8x128xbf16>
      %c0_48 = arith.constant 0 : index
      %c0_49 = arith.constant 0 : index
      %c0_50 = arith.constant 0 : index
      %101 = vector.load %arg4[%c0_48, %c0_49, %c0_50] : memref<1x128x384xbf16, #tpu.memory_space<vmem>>, vector<1x128x384xbf16>
      %102 = vector.shape_cast %101 : vector<1x128x384xbf16> to vector<128x384xbf16>
      %cst_51 = arith.constant dense<0.000000e+00> : vector<8x384xf32>
      %103 = tpu.matmul %100, %102, %cst_51 {dimension_numbers = #tpu.dot_dimension_numbers<[1], [0], [0], [1], [0, 0, 1, 1], [], []>} : vector<8x128xbf16>, vector<128x384xbf16>, vector<8x384xf32> -> vector<8x384xf32>
      %104 = vector.broadcast %75 : vector<1x384xf32> to vector<8x384xf32>
      %105 = arith.addf %103, %104 : vector<8x384xf32>
      %106 = vector.extract_strided_slice %105 {offsets = [0, 0], sizes = [8, 128], strides = [1, 1]} : vector<8x384xf32> to vector<8x128xf32>
      %107 = vector.shape_cast %106 : vector<8x128xf32> to vector<8x4x32xf32>
      %108 = arith.truncf %107 : vector<8x4x32xf32> to vector<8x4x32xbf16>
      %109 = vector.extract_strided_slice %105 {offsets = [0, 128], sizes = [8, 128], strides = [1, 1]} : vector<8x384xf32> to vector<8x128xf32>
      %110 = vector.shape_cast %109 : vector<8x128xf32> to vector<8x4x32xf32>
      %111 = arith.truncf %110 : vector<8x4x32xf32> to vector<8x4x32xbf16>
      %112 = vector.extract_strided_slice %105 {offsets = [0, 256], sizes = [8, 128], strides = [1, 1]} : vector<8x384xf32> to vector<8x128xf32>
      %113 = vector.shape_cast %112 : vector<8x128xf32> to vector<8x4x32xf32>
      %114 = arith.truncf %113 : vector<8x4x32xf32> to vector<8x4x32xbf16>
      "tpu.trace_start"() <{level = 10 : i32, message = "qhd,khd->hqk"}> : () -> ()
      %cst_52 = arith.constant dense<0.000000e+00> : vector<4x8x8xf32>
      %115 = tpu.matmul %108, %111, %cst_52 {dimension_numbers = #tpu.dot_dimension_numbers<[2], [2], [0], [0], [0, 1, 0, 0, 1, 0], [1], [1]>} : vector<8x4x32xbf16>, vector<8x4x32xbf16>, vector<4x8x8xf32> -> vector<4x8x8xf32>
      "tpu.trace_stop"() : () -> ()
      %cst_53 = arith.constant dense<0xFF800000> : vector<4x8xf32>
      %116 = vector.multi_reduction <maximumf>, %115, %cst_53 [2] : vector<4x8x8xf32> to vector<4x8xf32>
      %117 = vector.shape_cast %116 : vector<4x8xf32> to vector<4x8x1xf32>
      %118 = vector.broadcast %117 : vector<4x8x1xf32> to vector<4x8x8xf32>
      %119 = arith.subf %115, %118 : vector<4x8x8xf32>
      %120 = math.exp %119 : vector<4x8x8xf32>
      %cst_54 = arith.constant dense<0.000000e+00> : vector<4x8xf32>
      %121 = vector.multi_reduction <add>, %120, %cst_54 [2] : vector<4x8x8xf32> to vector<4x8xf32>
      %122 = vector.shape_cast %121 : vector<4x8xf32> to vector<4x8x1xf32>
      %123 = tpu.reciprocal %122 : vector<4x8x1xf32> -> vector<4x8x1xf32>
      %124 = vector.broadcast %123 : vector<4x8x1xf32> to vector<4x8x8xf32>
      %125 = arith.mulf %120, %124 : vector<4x8x8xf32>
      %126 = arith.truncf %125 : vector<4x8x8xf32> to vector<4x8x8xbf16>
      "tpu.trace_start"() <{level = 10 : i32, message = "hqk,khd->qhd"}> : () -> ()
      %cst_55 = arith.constant dense<0.000000e+00> : vector<4x32x8xf32>
      %127 = tpu.matmul %114, %126, %cst_55 {dimension_numbers = #tpu.dot_dimension_numbers<[0], [2], [2], [1], [0, 1, 0, 2, 1, 1], [1], [0]>} : vector<8x4x32xbf16>, vector<4x8x8xbf16>, vector<4x32x8xf32> -> vector<4x32x8xf32>
      %128 = tpu.transpose %127, [2, 0, 1] : vector<4x32x8xf32> -> vector<8x4x32xf32>
      "tpu.trace_stop"() : () -> ()
      %129 = vector.shape_cast %128 : vector<8x4x32xf32> to vector<8x128xf32>
      %130 = arith.truncf %129 : vector<8x128xf32> to vector<8x128xbf16>
      %c0_56 = arith.constant 0 : index
      %c0_57 = arith.constant 0 : index
      %c0_58 = arith.constant 0 : index
      %131 = vector.load %arg5[%c0_56, %c0_57, %c0_58] : memref<1x128x128xbf16, #tpu.memory_space<vmem>>, vector<1x128x128xbf16>
      %132 = vector.shape_cast %131 : vector<1x128x128xbf16> to vector<128x128xbf16>
      %cst_59 = arith.constant dense<0.000000e+00> : vector<8x128xf32>
      %133 = tpu.matmul %130, %132, %cst_59 {dimension_numbers = #tpu.dot_dimension_numbers<[1], [0], [0], [1], [0, 0, 1, 1], [], []>} : vector<8x128xbf16>, vector<128x128xbf16>, vector<8x128xf32> -> vector<8x128xf32>
      %134 = vector.broadcast %77 : vector<1x128xf32> to vector<8x128xf32>
      %135 = arith.addf %133, %134 : vector<8x128xf32>
      %136 = arith.addf %69, %135 : vector<8x128xf32>
      %c0_60 = arith.constant 0 : index
      %c0_61 = arith.constant 0 : index
      %137 = vector.load %arg11[%c0_60, %c0_61] : memref<8x128xf32, #tpu.memory_space<vmem>>, vector<8x128xf32>
      tpu.vector_store %arg11[%c0_60, %c0_61], %136 {strides = array<i32>} : memref<8x128xf32, #tpu.memory_space<vmem>>, vector<8x128xf32>,
      %cst_62 = arith.constant 0.000000e+00 : f32
      %138 = vector.broadcast %cst_62 : f32 to vector<8x128xf32>
      %c0_63 = arith.constant 0 : index
      %c0_64 = arith.constant 0 : index
      %139 = vector.load %arg12[%c0_63, %c0_64] : memref<8x128xf32, #tpu.memory_space<vmem>>, vector<8x128xf32>
      tpu.vector_store %arg12[%c0_63, %c0_64], %138 {strides = array<i32>} : memref<8x128xf32, #tpu.memory_space<vmem>>, vector<8x128xf32>,
    } else {
    }
    %c0_7 = arith.constant 0 : index
    %c0_8 = arith.constant 0 : index
    %12 = vector.load %arg11[%c0_7, %c0_8] : memref<8x128xf32, #tpu.memory_space<vmem>>, vector<8x128xf32>
    %cst = arith.constant dense<0.000000e+00> : vector<8xf32>
    %13 = vector.multi_reduction <add>, %12, %cst [1] : vector<8x128xf32> to vector<8xf32>
    %14 = vector.shape_cast %13 : vector<8xf32> to vector<8x1xf32>
    %cst_9 = arith.constant 1.280000e+02 : f32
    %15 = vector.broadcast %cst_9 : f32 to vector<8x1xf32>
    %16 = arith.divf %14, %15 : vector<8x1xf32>
    %17 = vector.broadcast %16 : vector<8x1xf32> to vector<8x128xf32>
    %18 = arith.subf %12, %17 : vector<8x128xf32>
    %19 = arith.mulf %18, %18 : vector<8x128xf32>
    %cst_10 = arith.constant dense<0.000000e+00> : vector<8xf32>
    %20 = vector.multi_reduction <add>, %19, %cst_10 [1] : vector<8x128xf32> to vector<8xf32>
    %21 = vector.shape_cast %20 : vector<8xf32> to vector<8x1xf32>
    %cst_11 = arith.constant 1.280000e+02 : f32
    %22 = vector.broadcast %cst_11 : f32 to vector<8x1xf32>
    %23 = arith.divf %21, %22 : vector<8x1xf32>
    %24 = vector.broadcast %16 : vector<8x1xf32> to vector<8x128xf32>
    %25 = arith.subf %12, %24 : vector<8x128xf32>
    %cst_12 = arith.constant 9.99999974E-6 : f32
    %26 = vector.broadcast %cst_12 : f32 to vector<8x1xf32>
    %27 = arith.addf %23, %26 : vector<8x1xf32>
    %28 = math.rsqrt %27 : vector<8x1xf32>
    %29 = vector.broadcast %28 : vector<8x1xf32> to vector<8x128xf32>
    %30 = arith.mulf %25, %29 : vector<8x128xf32>
    %31 = vector.broadcast %6 : vector<1x128xf32> to vector<8x128xf32>
    %32 = arith.mulf %30, %31 : vector<8x128xf32>
    %33 = vector.broadcast %8 : vector<1x128xf32> to vector<8x128xf32>
    %34 = arith.addf %32, %33 : vector<8x128xf32>
    %c128_i32 = arith.constant 128 : i32
    %35 = arith.muli %arg2, %c128_i32 : i32
    %36 = tpu.assume_multiple %35, 128 : i32
    %c0_13 = arith.constant 0 : index
    %c1 = arith.constant 1 : index
    %37 = arith.index_cast %36 : i32 to index
    %38 = vector.load %arg8[%c0_13, %c1, %37] : memref<1x8x512xf32, #tpu.memory_space<vmem>>, vector<1x1x128xf32>
    %39 = vector.shape_cast %38 : vector<1x1x128xf32> to vector<1x128xf32>
    %40 = arith.truncf %34 : vector<8x128xf32> to vector<8x128xbf16>
    %c0_14 = arith.constant 0 : index
    %c0_15 = arith.constant 0 : index
    %c0_16 = arith.constant 0 : index
    %41 = vector.load %arg6[%c0_14, %c0_15, %c0_16] : memref<1x128x128xbf16, #tpu.memory_space<vmem>>, vector<1x128x128xbf16>
    %42 = vector.shape_cast %41 : vector<1x128x128xbf16> to vector<128x128xbf16>
    %cst_17 = arith.constant dense<0.000000e+00> : vector<8x128xf32>
    %43 = tpu.matmul %40, %42, %cst_17 {dimension_numbers = #tpu.dot_dimension_numbers<[1], [0], [0], [1], [0, 0, 1, 1], [], []>} : vector<8x128xbf16>, vector<128x128xbf16>, vector<8x128xf32> -> vector<8x128xf32>
    %44 = vector.broadcast %39 : vector<1x128xf32> to vector<8x128xf32>
    %45 = arith.addf %43, %44 : vector<8x128xf32>
    %cst_18 = arith.constant 5.000000e-01 : f32
    %46 = vector.broadcast %cst_18 : f32 to vector<8x128xf32>
    %47 = arith.mulf %46, %45 : vector<8x128xf32>
    %cst_19 = arith.constant 0.707106769 : f32
    %48 = vector.broadcast %cst_19 : f32 to vector<8x128xf32>
    %49 = arith.mulf %45, %48 : vector<8x128xf32>
    %50 = math.erf %49 : vector<8x128xf32>
    %cst_20 = arith.constant 1.000000e+00 : f32
    %51 = vector.broadcast %cst_20 : f32 to vector<8x128xf32>
    %52 = arith.addf %51, %50 : vector<8x128xf32>
    %53 = arith.mulf %47, %52 : vector<8x128xf32>
    %c0_21 = arith.constant 0 : index
    %c0_22 = arith.constant 0 : index
    %54 = vector.load %arg12[%c0_21, %c0_22] : memref<8x128xf32, #tpu.memory_space<vmem>>, vector<8x128xf32>
    %55 = arith.truncf %53 : vector<8x128xf32> to vector<8x128xbf16>
    %c0_23 = arith.constant 0 : index
    %c0_24 = arith.constant 0 : index
    %c0_25 = arith.constant 0 : index
    %56 = vector.load %arg7[%c0_23, %c0_24, %c0_25] : memref<1x128x128xbf16, #tpu.memory_space<vmem>>, vector<1x128x128xbf16>
    %57 = vector.shape_cast %56 : vector<1x128x128xbf16> to vector<128x128xbf16>
    %cst_26 = arith.constant dense<0.000000e+00> : vector<8x128xf32>
    %58 = tpu.matmul %55, %57, %cst_26 {dimension_numbers = #tpu.dot_dimension_numbers<[1], [0], [0], [1], [0, 0, 1, 1], [], []>} : vector<8x128xbf16>, vector<128x128xbf16>, vector<8x128xf32> -> vector<8x128xf32>
    %59 = arith.addf %54, %58 : vector<8x128xf32>
    %c0_27 = arith.constant 0 : index
    %c0_28 = arith.constant 0 : index
    %60 = vector.load %arg12[%c0_27, %c0_28] : memref<8x128xf32, #tpu.memory_space<vmem>>, vector<8x128xf32>
    tpu.vector_store %arg12[%c0_27, %c0_28], %59 {strides = array<i32>} : memref<8x128xf32, #tpu.memory_space<vmem>>, vector<8x128xf32>,
    %c3_i32 = arith.constant 3 : i32
    %61 = arith.cmpi eq, %arg2, %c3_i32 : i32
    %62 = arith.extui %61 : i1 to i32
    %c0_i32_29 = arith.constant 0 : i32
    %63 = arith.cmpi ne, %62, %c0_i32_29 : i32
    scf.if %63 {
      %c0_32 = arith.constant 0 : index
      %c3 = arith.constant 3 : index
      %c0_33 = arith.constant 0 : index
      %69 = vector.load %arg8[%c0_32, %c3, %c0_33] : memref<1x8x512xf32, #tpu.memory_space<vmem>>, vector<1x1x128xf32>
      %70 = vector.shape_cast %69 : vector<1x1x128xf32> to vector<1x128xf32>
      %c0_34 = arith.constant 0 : index
      %c0_35 = arith.constant 0 : index
      %71 = vector.load %arg11[%c0_34, %c0_35] : memref<8x128xf32, #tpu.memory_space<vmem>>, vector<8x128xf32>
      %c0_36 = arith.constant 0 : index
      %c0_37 = arith.constant 0 : index
      %72 = vector.load %arg12[%c0_36, %c0_37] : memref<8x128xf32, #tpu.memory_space<vmem>>, vector<8x128xf32>
      %73 = arith.addf %71, %72 : vector<8x128xf32>
      %74 = vector.broadcast %70 : vector<1x128xf32> to vector<8x128xf32>
      %75 = arith.addf %73, %74 : vector<8x128xf32>
      %c0_38 = arith.constant 0 : index
      %c0_39 = arith.constant 0 : index
      %76 = vector.load %arg10[%c0_38, %c0_39] : memref<8x128xf32, #tpu.memory_space<vmem>>, vector<8x128xf32>
      tpu.vector_store %arg10[%c0_38, %c0_39], %75 {strides = array<i32>} : memref<8x128xf32, #tpu.memory_space<vmem>>, vector<8x128xf32>,
    } else {
    }
    %c1_i32 = arith.constant 1 : i32
    %64 = arith.cmpi eq, %arg1, %c1_i32 : i32
    %c3_i32_30 = arith.constant 3 : i32
    %65 = arith.cmpi eq, %arg2, %c3_i32_30 : i32
    %66 = arith.andi %64, %65 : i1
    %67 = arith.extui %66 : i1 to i32
    %c0_i32_31 = arith.constant 0 : i32
    %68 = arith.cmpi ne, %67, %c0_i32_31 : i32
    scf.if %68 {
      %c0_32 = arith.constant 0 : index
      %c0_33 = arith.constant 0 : index
      %69 = vector.load %arg10[%c0_32, %c0_33] : memref<8x128xf32, #tpu.memory_space<vmem>>, vector<8x128xf32>
      %c0_34 = arith.constant 0 : index
      %c0_35 = arith.constant 0 : index
      %70 = vector.load %arg9[%c0_34, %c0_35] : memref<2x128xf32, #tpu.memory_space<vmem>>, vector<1x128xf32>
      %c1_36 = arith.constant 1 : index
      %c0_37 = arith.constant 0 : index
      %71 = vector.load %arg9[%c1_36, %c0_37] : memref<2x128xf32, #tpu.memory_space<vmem>>, vector<1x128xf32>
      %cst_38 = arith.constant dense<0.000000e+00> : vector<8xf32>
      %72 = vector.multi_reduction <add>, %69, %cst_38 [1] : vector<8x128xf32> to vector<8xf32>
      %73 = vector.shape_cast %72 : vector<8xf32> to vector<8x1xf32>
      %cst_39 = arith.constant 1.280000e+02 : f32
      %74 = vector.broadcast %cst_39 : f32 to vector<8x1xf32>
      %75 = arith.divf %73, %74 : vector<8x1xf32>
      %76 = vector.broadcast %75 : vector<8x1xf32> to vector<8x128xf32>
      %77 = arith.subf %69, %76 : vector<8x128xf32>
      %78 = arith.mulf %77, %77 : vector<8x128xf32>
      %cst_40 = arith.constant dense<0.000000e+00> : vector<8xf32>
      %79 = vector.multi_reduction <add>, %78, %cst_40 [1] : vector<8x128xf32> to vector<8xf32>
      %80 = vector.shape_cast %79 : vector<8xf32> to vector<8x1xf32>
      %cst_41 = arith.constant 1.280000e+02 : f32
      %81 = vector.broadcast %cst_41 : f32 to vector<8x1xf32>
      %82 = arith.divf %80, %81 : vector<8x1xf32>
      %83 = vector.broadcast %75 : vector<8x1xf32> to vector<8x128xf32>
      %84 = arith.subf %69, %83 : vector<8x128xf32>
      %cst_42 = arith.constant 9.99999974E-6 : f32
      %85 = vector.broadcast %cst_42 : f32 to vector<8x1xf32>
      %86 = arith.addf %82, %85 : vector<8x1xf32>
      %87 = math.rsqrt %86 : vector<8x1xf32>
      %88 = vector.broadcast %87 : vector<8x1xf32> to vector<8x128xf32>
      %89 = arith.mulf %84, %88 : vector<8x128xf32>
      %90 = vector.broadcast %70 : vector<1x128xf32> to vector<8x128xf32>
      %91 = arith.mulf %89, %90 : vector<8x128xf32>
      %92 = vector.broadcast %71 : vector<1x128xf32> to vector<8x128xf32>
      %93 = arith.addf %91, %92 : vector<8x128xf32>
      %c0_43 = arith.constant 0 : index
      %c0_44 = arith.constant 0 : index
      %94 = vector.load %arg10[%c0_43, %c0_44] : memref<8x128xf32, #tpu.memory_space<vmem>>, vector<8x128xf32>
      tpu.vector_store %arg10[%c0_43, %c0_44], %93 {strides = array<i32>} : memref<8x128xf32, #tpu.memory_space<vmem>>, vector<8x128xf32>,
    } else {
    }
    return
  }
  func.func @transform_0(%arg0: i32, %arg1: i32, %arg2: i32) -> (i32, i32) {
    %c0_i32 = arith.constant 0 : i32
    %c0_i32_0 = arith.constant 0 : i32
    return %arg0, %c0_i32 : i32, i32
  }
  func.func @transform_1(%arg0: i32, %arg1: i32, %arg2: i32) -> (i32, i32, i32) {
    %c0_i32 = arith.constant 0 : i32
    %c0_i32_0 = arith.constant 0 : i32
    %c0_i32_1 = arith.constant 0 : i32
    return %arg1, %c0_i32, %c0_i32_0 : i32, i32, i32
  }
  func.func @transform_2(%arg0: i32, %arg1: i32, %arg2: i32) -> (i32, i32, i32) {
    %c0_i32 = arith.constant 0 : i32
    %c0_i32_0 = arith.constant 0 : i32
    %c0_i32_1 = arith.constant 0 : i32
    return %arg1, %c0_i32, %c0_i32_0 : i32, i32, i32
  }
  func.func @transform_3(%arg0: i32, %arg1: i32, %arg2: i32) -> (i32, i32, i32) {
    %c0_i32 = arith.constant 0 : i32
    %c0_i32_0 = arith.constant 0 : i32
    return %arg1, %c0_i32, %arg2 : i32, i32, i32
  }
  func.func @transform_4(%arg0: i32, %arg1: i32, %arg2: i32) -> (i32, i32, i32) {
    %c0_i32 = arith.constant 0 : i32
    %c0_i32_0 = arith.constant 0 : i32
    return %arg1, %arg2, %c0_i32 : i32, i32, i32
  }
  func.func @transform_5(%arg0: i32, %arg1: i32, %arg2: i32) -> (i32, i32, i32) {
    %c0_i32 = arith.constant 0 : i32
    %c0_i32_0 = arith.constant 0 : i32
    %c0_i32_1 = arith.constant 0 : i32
    return %arg1, %c0_i32, %c0_i32_0 : i32, i32, i32
  }
  func.func @transform_6(%arg0: i32, %arg1: i32, %arg2: i32) -> (i32, i32) {
    %c0_i32 = arith.constant 0 : i32
    %c0_i32_0 = arith.constant 0 : i32
    %c0_i32_1 = arith.constant 0 : i32
    return %c0_i32, %c0_i32_0 : i32, i32
  }
  func.func @transform_7(%arg0: i32, %arg1: i32, %arg2: i32) -> (i32, i32) {
    %c0_i32 = arith.constant 0 : i32
    %c0_i32_0 = arith.constant 0 : i32
    return %arg0, %c0_i32 : i32, i32
  }
}

</mosaic_0001>

<bundles_post_ra>
// kernel: tpu_custom_call.1
= control target key start
LH: loop header
LB: loop body
LE: loop exit
PB: predicated region body
PF: predicated region fallthrough
CT: control target
= control target key end

     0   :  { %s6911_s0 = inlined_call_operand.hbm [shape: f32[16,128], index: 0, kind: input, shape index: {}]   ;;  %s6912_s1 = inlined_call_operand.hbm [shape: bf16[2,128,384], index: 1, kind: input, shape index: {}]   ;;  %s6913_s2 = inlined_call_operand.hbm [shape: bf16[2,128,128], index: 2, kind: input, shape index: {}]   ;;  %s6914_s3 = inlined_call_operand.hbm [shape: bf16[2,128,512], index: 3, kind: input, shape index: {}]   ;;  %s6915_s4 = inlined_call_operand.hbm [shape: bf16[2,512,128], index: 4, kind: input, shape index: {}]   ;;  %s6916_s5 = inlined_call_operand.hbm [shape: f32[2,8,512], index: 5, kind: input, shape index: {}]   ;;  %s6917_s6 = inlined_call_operand.vmem [shape: f32[2,128], index: 6, kind: input, shape index: {}]   ;;  %s6918_s7 = inlined_call_operand.hbm [shape: f32[16,128], index: 7, kind: output, shape index: {}]  }
   0x1   :  { %6950 = sst [smem:[#allocation41_spill]] %s6911_s0 }
   0x2   :  { %6951 = sst [smem:[#allocation42_spill]] %s6912_s1 }
   0x3   :  { %6952 = sst [smem:[#allocation43_spill]] %s6913_s2 }
   0x4   :  { %6953 = sst [smem:[#allocation44_spill]] %s6914_s3 }
   0x5   :  { %6954 = sst [smem:[#allocation45_spill]] %s6915_s4 }
   0x6   :  { %6955 = sst [smem:[#allocation46_spill]] %s6916_s5 }
   0x7   :  { %6956 = sst [smem:[#allocation47_spill]] %s6917_s6 }
   0x8   :  { %6957 = sst [smem:[#allocation48_spill]] %s6918_s7 }
   0x9   :  { %12 = vsyncpa [#allocation5], 0 }
   0xa   :  { %14 = vsyncpa [#allocation5 + $0x1], 0 }
   0xb   :  { %15 = vsyncpa [#allocation8], 0 }
   0xc   :  { %17 = vsyncpa [#allocation8 + $0x1], 0 }
   0xd   :  { %18 = vsyncpa [#allocation11], 0 }
   0xe   :  { %20 = vsyncpa [#allocation11 + $0x1], 0 }
   0xf   :  { %21 = vsyncpa [#allocation14], 0 }
  0x10   :  { %23 = vsyncpa [#allocation14 + $0x1], 0 }
  0x11   :  { %24 = vsyncpa [#allocation6], 0 }
  0x12   :  { %26 = vsyncpa [#allocation6 + $0x1], 0  ;;  %s5847_s24 = smov 0   ;;  %s5849_s25 = smov 0  }
  0x13   :  { %s5851_s26 = smov 0   ;;  %s5853_s27 = smov 0  }
  0x14   :  { %s5855_s28 = smov 0   ;;  %s5857_s29 = smov 0  }
  0x15   :  { %s5859_s30 = smov 0   ;;  %s5861_s8 = smov 0  }
  0x16   :  { %s5863_s9 = smov 0   ;;  %s5865_s10 = smov 0  }
  0x17   :  { %s5867_s11 = smov 0   ;;  %s5869_s12 = smov 0  }
  0x18   :  { %s5871_s13 = smov 0   ;;  %s5873_s14 = smov 0  }
  0x19   :  { %s5875_s15 = smov 0   ;;  %s5877_s16 = smov 0  }
  0x1a LB: > { %6958 = sst [smem:[#allocation21_spill]] %s5731_s26  ;;  %p66_p0 = scmp.eq.s32.totalorder %s5783_s16, 0  ;;  %s5783_s16 = sphi %s5877_s16, %s32_s16   ;;  %s5779_s15 = sphi %s5875_s15, %s7039_s15   ;;  %s5775_s14 = sphi %s5873_s14, %s7047_s14   ;;  %s5771_s13 = sphi %s5871_s13, %s7046_s13   ;;  %s5767_s12 = sphi %s5869_s12, %s7036_s12   ;;  %s5763_s11 = sphi %s5867_s11, %s7045_s11   ;;  %s5759_s10 = sphi %s5865_s10, %s7044_s10   ;;  %s5755_s9 = sphi %s5863_s9, %s7035_s9   ;;  %s5751_s8 = sphi %s5861_s8, %s7043_s8   ;;  %s5747_s30 = sphi %s5859_s30, %s7042_s30   ;;  %s5743_s29 = sphi %s5857_s29, %s7033_s29   ;;  %s5739_s28 = sphi %s5855_s28, %s7032_s28   ;;  %s5735_s27 = sphi %s5853_s27, %s7031_s27   ;;  %s5731_s26 = sphi %s5851_s26, %s7030_s26   ;;  %s5727_s25 = sphi %s5849_s25, %s7041_s25   ;;  %s5723_s24 = sphi %s5847_s24, %s7040_s24  }
  0x1b   : > { %6959 = sst [smem:[#allocation22_spill]] %s5739_s28  ;;  %p91_p1 = scmp.ne.s32.totalorder %s5743_s29, %s5739_s28 }
  0x1c   : > { %6960 = sst [smem:[#allocation23_spill]] %s5743_s29  ;;  %p97_p2 = scmp.ne.s32.totalorder %s5739_s28, %s5735_s27 }
  0x1d   : > { %6961 = sst [smem:[#allocation24_spill]] %s5755_s9  ;;  %p6926_p3 = scmp.lt.s32.totalorder %s5783_s16, 16 }
  0x1e   : > { %6962 = sst [smem:[#allocation25_spill]] %s5759_s10  ;;  %p93_p4 = por %p91_p1, %p66_p0 }
  0x1f   : > { %6963 = sst [smem:[#allocation26_spill]] %s5763_s11  ;;  %s6922_s18 = sand.u32 1, %s5783_s16  }
  0x20   : > { %6964 = sst [smem:[#allocation27_spill]] %s5767_s12  ;;  %s5938_s19 = sand.u32 1, %s5743_s29  }
  0x21   : > { %6965 = sst [smem:[#allocation28_spill]] %s5779_s15  ;;  %s5176_s20 = smul.u32 192, %s5938_s19 }
  0x22   : > { %p5943_p5 = pnand %p6926_p3, %p93_p4  ;;  %s5177_s22 = smul.u32 3072, %s5775_s14 }
  0x23   : > { %s6967_s1 = sld [smem:[#allocation42_spill]]  ;;  %s301_s12 = scalar_lea.vmem [#allocation7], %s5176_s20 }
  0x24   : > { %s308_s6 = sshll.u32 %s301_s12, 4  ;;  %s5953_s10 = scalar_lea.sflag [#allocation8], %s6922_s18  ;;  %s309_s6 = int_to_ptr.vmem [resolvable:$true] %s308_s6 }
  0x25   : > { %6968 = sst [smem:[#allocation29_spill]] %s5953_s10  ;;  %p6925_p6 = pneg %p5943_p5 }
  0x26   : > { %s5456_s11 = scalar_lea.vmem %s309_s6, 3072  ;;  %s5785_s5 = smov [#allocation7]  }
  0x27   : > { %p5457_p7 = scmp.ne.s32.totalorder %s309_s6, %s5456_s11  ;;  %s5461_s4 = sshll.u32 %s5785_s5, 4  ;;  %s5462_s4 = int_to_ptr.vmem [resolvable:$false] %s5461_s4 }
  0x28   : > { %s5463_s2 = scalar_lea.vmem %s5462_s4, 6144  ;;  %p5464_p10 = scmp.lt.s32.totalorder %s309_s6, %s5462_s4 }
  0x29   : > { %s307_s7 = scalar_lea.hbm %s6967_s1, %s5177_s22  ;;  %p5459_p8 = pnand %p5457_p7, %p6925_p6 }
  0x2a   : > { %p5465_p11 = scmp.lt.s32.totalorder %s5463_s2, %s5456_s11 }
  0x2b   : > { %p5460_p9 = pneg %p5459_p8 }
  0x2c   : > { %p5466_p12 = por %p5465_p11, %p5464_p10 }
  0x2e   : > { %p5467_p13 = pnand %p5466_p12, %p5460_p9 }
  0x30   : > { %5470 = shalt.err (!%p5467_p13)
}
  0x31   : > { %s5786_s12 = smov 192   ;;  %s5787_s4 = smov 12  }
  0x32   : > { %5199 = dma.hbm_to_vmem [thread:$0]  (!%p5943_p5), %s307_s7, 3072, %s309_s6, %s5953_s10, %s5786_s12, %s5786_s12, %s5787_s4  }
  0x33   : > { %p4891_p1 = scmp.ge.s32.totalorder %s5783_s16, 1  ;;  %p401_p4 = scmp.lt.s32.totalorder %s5783_s16, 17 }
  0x34   : > { %s44_s5 = sadd.s32 1, %s5771_s13  ;;  %p145_p9 = scmp.ne.s32.totalorder %s5731_s26, %s5727_s25 }
  0x35   : > { %p5965_p7 = pnand %p4891_p1, %p401_p4  ;;  %p5971_p8 = scmp.ge.s32.totalorder %s44_s5, 4 }
  0x36   : > { %p147_p11 = por %p145_p9, %p66_p0  ;;  %s341_s7 = sand.u32 1, %s5731_s26  }
  0x37   : > { %s6969_s2 = scalar_select %p5965_p7, 1, 0 }
  0x38   : > { %s7049_s5 = smov (%p5971_p8, %s44_s5), 0  ;;  %s5988_s20 = sshll.u32 %s341_s7, 6 }
  0x39   : > { %6970 = sst [smem:[#allocation30_spill]] %s6969_s2  ;;  %s6927_s22 = sshll.u32 %s5775_s14, 6 }
  0x3a   : > { %6972 = sst [smem:[#allocation31_spill]] %s7049_s5  ;;  %s348_s23 = sadd.s32 %s5771_s13, %s6927_s22 }
  0x3b   : > { %s4883_s12 = sshll.u32 %s348_s23, 6  ;;  %s343_s4 = scalar_lea.vmem [#allocation10], %s5988_s20 }
  0x3c   : > { %s351_s11 = sshll.u32 %s343_s4, 4  ;;  %s6973_s3 = sld [smem:[#allocation44_spill]]  ;;  %s352_s11 = int_to_ptr.vmem [resolvable:$true] %s351_s11 }
  0x3d   : > { %p6000_p12 = pnand %p6926_p3, %p147_p11  ;;  %s6975_s6 = sand.u32 1, %s5783_s16  }
  0x3e   : > { %s6006_s7 = scalar_lea.sflag [#allocation11], %s6975_s6  ;;  %s5484_s23 = scalar_lea.vmem %s352_s11, 1024 }
  0x3f   : > { %6976 = sst [smem:[#allocation32_spill]] %s6006_s7  ;;  %p6936_p13 = pneg %p6000_p12 }
  0x40   : > { %p5485_p1 = scmp.ne.s32.totalorder %s352_s11, %s5484_s23  ;;  %s5788_s1 = smov [#allocation10]  }
  0x41   : > { %s5489_s18 = sshll.u32 %s5788_s1, 4  ;;  %s5490_s18 = int_to_ptr.vmem [resolvable:$false] %s5489_s18 }
  0x42   : > { %s350_s2 = scalar_lea.hbm %s6973_s3, %s4883_s12  ;;  %p5487_p4 = pnand %p5485_p1, %p6936_p13 }
  0x43   : > { %s5491_s12 = scalar_lea.vmem %s5490_s18, 2048  ;;  %p5492_p11 = scmp.lt.s32.totalorder %s352_s11, %s5490_s18 }
  0x44   : > { %p5488_p9 = pneg %p5487_p4  ;;  %p5493_p6 = scmp.lt.s32.totalorder %s5491_s12, %s5484_s23 }
  0x46   : > { %p5494_p3 = por %p5493_p6, %p5492_p11 }
  0x48   : > { %p5495_p10 = pnand %p5494_p3, %p5488_p9 }
  0x4a   : > { %5498 = shalt.err (!%p5495_p10)
}
  0x4b   : > { %s5789_s4 = smov 256   ;;  %s6928_s6 = smov 64  }
  0x4c   : > { %s6930_s23 = smov 4   ;;  %s6019_s1 = sadd.s32 4294967295, %s5783_s16  }
  0x4d   : > { %5205 = dma.hbm_to_vmem [thread:$0]  (!%p6000_p12), %s350_s2, 1024, %s352_s11, %s6006_s7, %s5789_s4, %s6928_s6, %s6930_s23  }
  0x4e   : > { %s4872_s18 = sadd.s32 4294967294, %s5783_s16   ;;  %s47_s12 = sadd.s32 1, %s5775_s14 }
  0x4f   : > { %s7051_s12 = smov (!%p5971_p8, %s47_s12), %s5775_s14  ;;  %s51_s22 = sadd.s32 1, %s5779_s15 }
  0x50   : > { %s58_s3 = sadd.s32 1, %s5755_s9  ;;  %p49_p3 = scmp.ge.s32.totalorder %s7051_s12, 2 }
  0x51   : > { %p65_p6 = scmp.ne.s32.totalorder %s5755_s9, %s5751_s8  ;;  %p6937_p10 = scmp.ne.s32.totalorder %s5751_s8, %s5747_s30 }
  0x52   : > { %p72_p1 = scmp.eq.s32.totalorder %s6019_s1, 0  ;;  %s7053_s12 = smov (%p49_p3, %s7051_s12), 0 }
  0x53   : > { %6977 = sst [smem:[#allocation33_spill]] %s7053_s12  ;;  %s7055_s22 = smov (!%p49_p3, %s51_s22), %s5779_s15 }
  0x54   : > { %p6041_p8 = por %p66_p0, %p65_p6  ;;  %p6050_p4 = por %p72_p1, %p6937_p10 }
  0x55   : > { %p53_p9 = scmp.ge.s32.totalorder %s7055_s22, 2  ;;  %s81_s17 = ssub.s32 %s5775_s14, %s7053_s12 }
  0x56   : > { %s6979_s11 = scalar_select %p6050_p4, 1, 0 }
  0x57   : > { %p82_p11 = scmp.eq.s32.totalorder %s81_s17, 0  ;;  %p6061_p0 = por %p97_p2, %p72_p1 }
  0x58   : > { %6980 = sst [smem:[#allocation34_spill]] %s6979_s11  ;;  %s7057_s22 = smov (%p53_p9, %s7055_s22), 0 }
  0x59   : > { %s6981_s4 = scalar_select %p6061_p0, 1, 0 }
  0x5a   : > { %6983 = sst [smem:[#allocation36_spill]] %s7057_s22  ;;  %s6984_s6 = sadd.s32 1, %s5743_s29 }
  0x5b   : > { %6982 = sst [smem:[#allocation35_spill]] %s6981_s4  ;;  %s55_s11 = ssub.s32 %s5779_s15, %s7057_s22 }
  0x5c   : > { %s6070_s23 = scalar_select %p82_p11, %s5743_s29, %s6984_s6  }
  0x5d   : > { %s6986_s12 = ssub.s32 %s5771_s13, %s7049_s5  ;;  %p56_p3 = scmp.eq.s32.totalorder %s55_s11, 0 }
  0x5e   : > { %6985 = sst [smem:[#allocation37_spill]] %s6070_s23  ;;  %s135_s7 = sor.u32 %s6986_s12, %s81_s17 }
  0x5f   : > { %p136_p13 = scmp.eq.s32.totalorder %s135_s7, 0  ;;  %p6987_p10 = scmp.ne.s32.totalorder %s5727_s25, %s5723_s24 }
  0x60   : > { %p250_p9 = scmp.eq.s32.totalorder %s6019_s1, 15  ;;  %s6990_s28 = sadd.s32 1, %s5731_s26 }
  0x61   : > { %p6082_p2 = por %p6987_p10, %p72_p1  ;;  %p256_p0 = scmp.eq.s32.totalorder %s4872_s18, 15 }
  0x62   : > { %s6088_s4 = scalar_select %p56_p3, %s5755_s9, %s58_s3  }
  0x63   : > { %s6093_s6 = scalar_select %p136_p13, %s5731_s26, %s6990_s28  }
  0x64   : > { %6989 = sst [smem:[#allocation38_spill]] %s6088_s4  ;;  %p6098_p11 = por %p250_p9, %p65_p6 }
  0x65   : > { %6991 = sst [smem:[#allocation39_spill]] %s6093_s6  ;;  %s279_s12 = sand.u32 1, %s5755_s9  }
  0x66   : > { %s4876_s7 = sshll.u32 %s5779_s15, 7  ;;  %p6993_p4 = scmp.ne.s32.totalorder %s5751_s8, %s5747_s30 }
  0x67   : > { %s4875_s11 = sshll.u32 %s279_s12, 3  ;;  %s6996_s0 = sld [smem:[#allocation41_spill]] }
  0x68   : > { %p6107_p7 = por %p256_p0, %p6993_p4  ;;  %p6997_p13 = scmp.lt.s32.totalorder %s5783_s16, 16 }
  0x69   : > { %s283_s18 = scalar_lea.vmem [#allocation4], %s4875_s11  ;;  %s4878_s15 = sshll.u32 %s5938_s19, 6 }
  0x6a   : > { %s6994_s24 = scalar_select %p6107_p7, 1, 0 }
  0x6b   : > { %p6118_p10 = pnand %p6997_p13, %p6041_p8  ;;  %s290_s4 = sshll.u32 %s283_s18, 4  ;;  %s291_s4 = int_to_ptr.vmem [resolvable:$true] %s290_s4 }
  0x6c   : > { %6995 = sst [smem:[#allocation40_spill]] %s6994_s24  ;;  %s280_s9 = scalar_lea.sflag [#allocation5], %s279_s12 }
  0x6d   : > { %s288_s5 = scalar_lea.hbm %s6996_s0, %s4876_s7  ;;  %p5501_p6 = pneg %p6118_p10 }
  0x6e   : > { %s5512_s23 = scalar_lea.vmem %s291_s4, 128  ;;  %s5792_s17 = smov [#allocation4]  }
  0x6f   : > { %p5513_p1 = scmp.ne.s32.totalorder %s291_s4, %s5512_s23  ;;  %s5517_s7 = sshll.u32 %s5792_s17, 4  ;;  %s5518_s7 = int_to_ptr.vmem [resolvable:$false] %s5517_s7 }
  0x70   : > { %s5519_s2 = scalar_lea.vmem %s5518_s7, 256  ;;  %p5520_p8 = scmp.lt.s32.totalorder %s291_s4, %s5518_s7 }
  0x71   : > { %p5515_p4 = pnand %p5513_p1, %p5501_p6  ;;  %p5521_p3 = scmp.lt.s32.totalorder %s5519_s2, %s5512_s23 }
  0x73   : > { %p5516_p0 = pneg %p5515_p4  ;;  %p5522_p9 = por %p5521_p3, %p5520_p8 }
  0x75   : > { %p5523_p13 = pnand %p5522_p9, %p5516_p0 }
  0x77   : > { %5526 = shalt.err (!%p5523_p13)
}
  0x78   : > { %5196 = dma.hbm_to_vmem [thread:$0]  (!%p6118_p10), %s288_s5, 128, %s291_s4, %s280_s9  }
  0x79   : > { %s4974_s12 = sshll.u32 %s5775_s14, 10  ;;  %s6999_s18 = sld [smem:[#allocation43_spill]] }
  0x7a   : > { %s322_s29 = scalar_lea.vmem [#allocation9], %s4878_s15  ;;  %p7000_p1 = pneg %p5943_p5 }
  0x7b   : > { %s329_s6 = sshll.u32 %s322_s29, 4  ;;  %s5793_s23 = smov [#allocation9]   ;;  %s330_s6 = int_to_ptr.vmem [resolvable:$true] %s329_s6 }
  0x7c   : > { %s5540_s17 = scalar_lea.vmem %s330_s6, 1024  ;;  %s5545_s7 = sshll.u32 %s5793_s23, 4  ;;  %s5546_s7 = int_to_ptr.vmem [resolvable:$false] %s5545_s7 }
  0x7d   : > { %p5541_p6 = scmp.ne.s32.totalorder %s330_s6, %s5540_s17  ;;  %s5547_s28 = scalar_lea.vmem %s5546_s7, 2048 }
  0x7e   : > { %p5548_p8 = scmp.lt.s32.totalorder %s330_s6, %s5546_s7  ;;  %p5549_p10 = scmp.lt.s32.totalorder %s5547_s28, %s5540_s17 }
  0x7f   : > { %s328_s0 = scalar_lea.hbm %s6999_s18, %s4974_s12  ;;  %p5543_p4 = pnand %p5541_p6, %p7000_p1 }
  0x80   : > { %p5550_p3 = por %p5549_p10, %p5548_p8 }
  0x81   : > { %p5544_p0 = pneg %p5543_p4 }
  0x83   : > { %p5551_p9 = pnand %p5550_p3, %p5544_p0 }
  0x85   : > { %5554 = shalt.err (!%p5551_p9)
}
  0x86   : > { %s7001_s9 = smov 4   ;;  %s7002_s29 = smov 64  }
  0x87   : > { %s7003_s15 = sld [smem:[#allocation29_spill]]  ;;  %s4885_s5 = sshll.u32 %s5771_s13, 4 }
  0x88   : > { %s365_s4 = scalar_lea.vmem [#allocation12], %s5988_s20  ;;  %s7004_s12 = sshll.u32 %s5775_s14, 6 }
  0x89   : > { %s374_s2 = sshll.u32 %s365_s4, 4  ;;  %s371_s11 = sadd.s32 %s4885_s5, %s7004_s12  ;;  %s375_s2 = int_to_ptr.vmem [resolvable:$true] %s374_s2 }
  0x8a   : > { %s4887_s3 = sshll.u32 %s371_s11, 6  ;;  %s7005_s23 = sld [smem:[#allocation45_spill]] }
  0x8b   : > { %s4888_s28 = sshll.u32 %s5938_s19, 5  ;;  %s5568_s26 = scalar_lea.vmem %s375_s2, 1024 }
  0x8c   : > { %p5569_p13 = scmp.ne.s32.totalorder %s375_s2, %s5568_s26  ;;  %p7006_p6 = pneg %p6000_p12 }
  0x8d   : > { %5202 = dma.hbm_to_vmem [thread:$0]  (!%p5943_p5), %s328_s0, 1024, %s330_s6, %s7003_s15, %s7002_s29, %s7002_s29, %s7001_s9  }
  0x8e   : > { %p5571_p1 = pnand %p5569_p13, %p7006_p6  ;;  %s5794_s24 = smov [#allocation12]  }
  0x8f   : > { %s5573_s0 = sshll.u32 %s5794_s24, 4  ;;  %s5574_s0 = int_to_ptr.vmem [resolvable:$false] %s5573_s0 }
  0x90   : > { %s373_s7 = scalar_lea.hbm %s7005_s23, %s4887_s3  ;;  %p5572_p4 = pneg %p5571_p1 }
  0x91   : > { %s5575_s20 = scalar_lea.vmem %s5574_s0, 2048  ;;  %p5576_p0 = scmp.lt.s32.totalorder %s375_s2, %s5574_s0 }
  0x92   : > { %p5577_p8 = scmp.lt.s32.totalorder %s5575_s20, %s5568_s26 }
  0x94   : > { %p5578_p10 = por %p5577_p8, %p5576_p0 }
  0x96   : > { %p5579_p3 = pnand %p5578_p10, %p5572_p4 }
  0x98   : > { %5582 = shalt.err (!%p5579_p3)
}
  0x99   : > { %s7007_s6 = sld [smem:[#allocation32_spill]]  ;;  %s4975_s15 = sshll.u32 %s5775_s14, 9 }
  0x9a   : > { %s7008_s4 = sld [smem:[#allocation46_spill]]  ;;  %s388_s11 = scalar_lea.vmem [#allocation13], %s4888_s28 }
  0x9b   : > { %s396_s26 = sshll.u32 %s388_s11, 4  ;;  %s385_s3 = scalar_lea.sflag [#allocation14], %s5938_s19  ;;  %s397_s26 = int_to_ptr.vmem [resolvable:$true] %s396_s26 }
  0x9c   : > { %s5596_s18 = scalar_lea.vmem %s397_s26, 512  ;;  %p7009_p13 = pneg %p5943_p5 }
  0x9d   : > { %p5597_p9 = scmp.ne.s32.totalorder %s397_s26, %s5596_s18  ;;  %s5795_s10 = smov [#allocation13]  }
  0x9e   : > { %s5601_s17 = sshll.u32 %s5795_s10, 4  ;;  %s5602_s17 = int_to_ptr.vmem [resolvable:$false] %s5601_s17 }
  0x9f   : > { %5208 = dma.hbm_to_vmem [thread:$0]  (!%p6000_p12), %s373_s7, 1024, %s375_s2, %s7007_s6, %s7002_s29, %s7002_s29, %s7001_s9  }
  0xa0   : > { %s394_s12 = scalar_lea.hbm %s7008_s4, %s4975_s15  ;;  %p5599_p6 = pnand %p5597_p9, %p7009_p13 }
  0xa1   : > { %s5603_s23 = scalar_lea.vmem %s5602_s17, 1024  ;;  %p5604_p12 = scmp.lt.s32.totalorder %s397_s26, %s5602_s17 }
  0xa2   : > { %p5600_p1 = pneg %p5599_p6  ;;  %p5605_p4 = scmp.lt.s32.totalorder %s5603_s23, %s5596_s18 }
  0xa4   : > { %p5606_p0 = por %p5605_p4, %p5604_p12 }
  0xa6   : > { %p5607_p8 = pnand %p5606_p0, %p5600_p1 }
  0xa8   : > { %5610 = shalt.err (!%p5607_p8)
}
  0xa9   : > { %5211 = dma.hbm_to_vmem [thread:$0]  (!%p5943_p5), %s394_s12, 512, %s397_s26, %s385_s3  }
  0xaa   : > { %s7010_s9 = sld [smem:[#allocation30_spill]] }
  0xb0   : > { %p7011_p10 = scmp.ne.s32.totalorder %s7010_s9, 0 }
  0xb1   : > { %s7012_s19 = sld [smem:[#allocation34_spill]] (!%p7011_p10)  ;;  %s6170_s29 = sand.u32 (!%p7011_p10), 1, %s5751_s8  }
  0xb2   : > { %405 = sbr.rel (%p7011_p10) target bundleno = 3535 (0xdcf), region = 48  ;;  %s4892_s2 = sshll.u32 (!%p7011_p10), %s6170_s29, 3 }
  0xb3   : > { %s408_s7 = scalar_lea.sflag (!%p7011_p10), [#allocation5], %s6170_s29  ;;  %s411_s28 = scalar_lea.vmem (!%p7011_p10), [#allocation4], %s4892_s2 }
  0xb7   : > { %p7013_p3 = scmp.ne.s32.totalorder %s7012_s19, 0 }
  0xb9   : > { %5702 = dma.done.wait (%p7013_p3), %s408_s7, 128  }
  0xba   : > { %5704 = vsyncadd (%p7013_p3), %s408_s7, 4294967168  ;;  %s7014_s21 = sld [smem:[#allocation22_spill]]  ;;  %s416_s20 = sand.u32 1, %s6019_s1  }
  0xbb   : > { %s7015_s0 = sld [smem:[#allocation35_spill]]  ;;  %s417_s5 = scalar_lea.sflag [#allocation8], %s416_s20 }
  0xc0   : > { %s418_s6 = sand.u32 1, %s7014_s21  }
  0xc1   : > { %s5178_s15 = smul.u32 192, %s418_s6  ;;  %p7016_p5 = scmp.ne.s32.totalorder %s7015_s0, 0 }
  0xc3   : > { %s6180_s24 = scalar_lea.vmem [#allocation7], %s5178_s15 }
  0xc4   : > { %5706 = dma.done.wait (%p7016_p5), %s417_s5, 4096  }
  0xc5   : > { %5708 = vsyncadd (%p7016_p5), %s417_s5, 4294963200  ;;  %s4893_s4 = sshll.u32 %s418_s6, 6  ;;  %s436_s12 = sand.u32 1, %s5727_s25  }
  0xc6   : > { %s4894_s11 = sshll.u32 %s436_s12, 6  ;;  %s6187_s26 = scalar_lea.vmem [#allocation9], %s4893_s4 }
  0xc7   : > { %s435_s3 = scalar_lea.sflag [#allocation11], %s416_s20  ;;  %s6189_s18 = scalar_lea.vmem [#allocation10], %s4894_s11 }
  0xc8   : > { %5710 = dma.done.wait (%p6082_p2), %s435_s3, 2048  }
  0xc9   : > { %5712 = vsyncadd (%p6082_p2), %s435_s3, 4294965248  ;;  %s4896_s1 = sshll.u32 %s418_s6, 5  ;;  %s6195_s10 = scalar_lea.vmem [#allocation12], %s4894_s11 }
  0xca   : > { %s453_s17 = scalar_lea.sflag [#allocation14], %s418_s6  ;;  %s6197_s23 = scalar_lea.vmem [#allocation13], %s4896_s1 }
  0xcb   : > { %5714 = dma.done.wait (%p7016_p5), %s453_s17, 512  }
  0xcc   : > { %5716 = vsyncadd (%p7016_p5), %s453_s17, 4294966784  ;;  %s7017_s9 = sld [smem:[#allocation26_spill]]  ;;  %s6205_s7 = scalar_lea.vmem [#allocation15], %s4892_s2 }
  0xcd   : > { %s7018_s19 = sld [smem:[#allocation25_spill]] }
  0xd2   : > { %p514_p9 = scmp.eq.s32.totalorder %s7017_s9, 0 }
  0xd3   : > { %p515_p13 = scmp.eq.s32.totalorder %s7018_s19, 0 }
  0xd5   : > { %p516_p6 = pnand %p515_p13, %p514_p9 }
  0xd7   : > { %519 = sbr.rel (%p516_p6) target bundleno = 222 (0xde), region = 76 }
  0xdc   : > { %v520_v0 = vld [vmem:[%s411_s28] sm:$0xff] }
  0xdd   : > { %521 = vst [vmem:[%s6205_s7] sm:$0xff] %v520_v0 }
  0xde PF: > { %v6209_v1 = vld [vmem:[%s6197_s23 + $0x6] ss:$0 sm:$0xff]  ;;  %v6212_v2 = vld [vmem:[%s6197_s23 + $0x7] ss:$0 sm:$0xff]  ;;  %s7019_s27 = sld [smem:[#allocation25_spill]] }
  0xe4   : > { %p4898_p2 = scmp.ne.s32.totalorder %s7019_s27, 0 }
  0xe5   : > { %s5799_s2 = smov (!%p4898_p2), 32   ;;  %s5800_s28 = smov (!%p4898_p2), 96  }
  0xe6   : > { %526 = sbr.rel (%p4898_p2) target bundleno = 2449 (0x991), region = 80  ;;  %s5801_s21 = smov (!%p4898_p2), 64  }
  0xeb   : > { %v527_v3 = vld [vmem:[%s6205_s7] sm:$0xff]  ;;  %v5796_v6 = vmov 0.0   ;;  %v5364_v7 = vld [vmem:[%s6180_s24 + $0xb0] ss:$12 sps:$4 sm:$0xff]   ;;  %v5797_v25 = vmov 0   ;;  %vm5798_vm0 = vmmov 0   ;;  %v580_v44 = vlaneseq }
  0xec   : > { %532 = vadd.xlane.f32.xlu0 %v527_v3  ;;  %v5361_v4 = vld [vmem:[%s6180_s24 + $0xac] ss:$12 sps:$4 sm:$0xff]   ;;  %v5363_v5 = vld [vmem:[%s6180_s24 + $0xa8] ss:$12 sps:$4 sm:$0xff]   ;;  %5036 = vmatprep.subr.bf16.mxu1 %v5796_v6  ;;  %4374 = vst [vmem:[#allocation3] sm:$0xff] %v5796_v6  ;;  %vm2332_vm1 = vcmask 261120  }
  0xed   : > { %v5365_v8 = vld [vmem:[%s6180_s24 + $0x94] ss:$12 sps:$4 sm:$0xff]   ;;  %723 = vmatprep.subr.bf16.mxu0 %v5361_v4  ;;  %5037 = vmatpush3.bf16.msra.mxu1 %v5364_v7  ;;  %v5367_v9 = vld [vmem:[%s6180_s24 + $0x90] ss:$12 sps:$4 sm:$0xff]   ;;  %v5368_v10 = vld [vmem:[%s6180_s24 + $0x98] ss:$12 sps:$4 sm:$0xff]  }
  0xee   : > { %724 = vmatpush1.bf16.msra.mxu0 %v5363_v5  ;;  %5038 = vmatprep.subr.bf16.mxu1 %v5796_v6  ;;  %v5369_v15 = vld [vmem:[%s6180_s24 + $0x7c] ss:$12 sps:$4 sm:$0xff]   ;;  %v5371_v16 = vld [vmem:[%s6180_s24 + $0x78] ss:$12 sps:$4 sm:$0xff]   ;;  %v5372_v17 = vld [vmem:[%s6180_s24 + $0x80] ss:$12 sps:$4 sm:$0xff]  }
  0xef   : > { %725 = vmatprep.subr.bf16.mxu0 %v5365_v8  ;;  %v5373_v18 = vld [vmem:[%s6180_s24 + $0x64] ss:$12 sps:$4 sm:$0xff]   ;;  %v5375_v19 = vld [vmem:[%s6180_s24 + $0x60] ss:$12 sps:$4 sm:$0xff]   ;;  %v5376_v20 = vld [vmem:[%s6180_s24 + $0x68] ss:$12 sps:$4 sm:$0xff]   ;;  %755 = vmatprep.mubr.bf16.mxu0 %v5797_v25 }
  0xf0   : > { %v5377_v21 = vld [vmem:[%s6180_s24 + $0x4c] ss:$12 sps:$4 sm:$0xff]   ;;  %v5379_v22 = vld [vmem:[%s6180_s24 + $0x48] ss:$12 sps:$4 sm:$0xff]   ;;  %v5380_v23 = vld [vmem:[%s6180_s24 + $0x50] ss:$12 sps:$4 sm:$0xff]   ;;  %5052 = vmatprep.mubr.msk.bf16.mxu1 %vm5798_vm0, %v5796_v6 }
  0xf1   : > { %5039 = vmatpush3.bf16.msra.mxu1 %v5368_v10  ;;  %v5381_v24 = vld [vmem:[%s6180_s24 + $0x34] ss:$12 sps:$4 sm:$0xff]   ;;  %v5383_v26 = vld [vmem:[%s6180_s24 + $0x30] ss:$12 sps:$4 sm:$0xff]   ;;  %v5384_v27 = vld [vmem:[%s6180_s24 + $0x38] ss:$12 sps:$4 sm:$0xff]  }
  0xf2   : > { %726 = vmatpush1.bf16.msra.mxu0 %v5367_v9  ;;  %5040 = vmatprep.subr.bf16.mxu1 %v5796_v6  ;;  %v5385_v28 = vld [vmem:[%s6180_s24 + $0x1c] ss:$12 sps:$4 sm:$0xff]   ;;  %v5387_v29 = vld [vmem:[%s6180_s24 + $0x18] ss:$12 sps:$4 sm:$0xff]   ;;  %v5388_v30 = vld [vmem:[%s6180_s24 + $0x20] ss:$12 sps:$4 sm:$0xff]  }
  0xf3   : > { %727 = vmatprep.subr.bf16.mxu0 %v5369_v15  ;;  %v5389_v31 = vld [vmem:[%s6180_s24 + $0x4] ss:$12 sps:$4 sm:$0xff]   ;;  %v5391_v32 = vld [vmem:[%s6180_s24] ss:$12 sps:$4 sm:$0xff]   ;;  %v5392_v33 = vld [vmem:[%s6180_s24 + $0x8] ss:$12 sps:$4 sm:$0xff]  }
  0xf4   : > { %v528_v38 = vld [vmem:[%s6197_s23 + $0x4] ss:$0 sm:$0xff]  ;;  %v529_v40 = vld [vmem:[%s6197_s23 + $0x5] ss:$0 sm:$0xff]  ;;  %v6257_v45 = vshrl.u32 %v580_v44, 7  ;;  %vm2505_vm2 = vcmask 64512  }
  0xf5   : > { %5041 = vmatpush3.bf16.msra.mxu1 %v5372_v17  ;;  %v6261_v47 = vld [vmem:[%s6197_s23] ss:$8 sm:$0x7]  ;;  %v5802_v61 = vmov 1983009808   ;;  %vm4263_vm3 = vcmask 523264  }
  0xf6   : > { %728 = vmatpush1.bf16.msra.mxu0 %v5371_v16  ;;  %5042 = vmatprep.subr.bf16.mxu1 %v5796_v6  ;;  %v586_v46 = vsub.s32 1, %v6257_v45  ;;  %v582_v48 = vsub.s32 0, %v6257_v45  ;;  %v817_v62 = vunpack.c.l.s4 %v5802_v61  ;;  %v5803_v63 = vmov 1934713408  }
  0xf7   : > { %729 = vmatprep.subr.bf16.mxu0 %v5373_v18  ;;  %v849_v0 = vunpack.c.l.s4 %v5803_v63  ;;  %vm4265_vm4 = vcmask 785408  }
  0xf8   : > { %v587_v49 = vrot.slane %v6261_v47, %v586_v46  ;;  %v583_v54 = vrot.slane %v6261_v47, %v582_v48 }
  0xf9   : > { %5043 = vmatpush3.bf16.msra.mxu1 %v5376_v20  ;;  %v850_v7 = vunpack.c.0.s8 %v849_v0 }
  0xfa   : > { %730 = vmatpush1.bf16.msra.mxu0 %v5375_v19  ;;  %5044 = vmatprep.subr.bf16.mxu1 %v5796_v6 }
  0xfb   : > { %731 = vmatprep.subr.bf16.mxu0 %v5377_v21 }
  0xfd   : > { %5045 = vmatpush3.bf16.msra.mxu1 %v5380_v23 }
  0xfe   : > { %732 = vmatpush1.bf16.msra.mxu0 %v5379_v22  ;;  %5046 = vmatprep.subr.bf16.mxu1 %v5796_v6 }
  0xff   : > { %733 = vmatprep.subr.bf16.mxu0 %v5381_v24 }
 0x101   : > { %5047 = vmatpush3.bf16.msra.mxu1 %v5384_v27 }
 0x102   : > { %734 = vmatpush1.bf16.msra.mxu0 %v5383_v26  ;;  %5048 = vmatprep.subr.bf16.mxu1 %v5796_v6 }
 0x103   : > { %735 = vmatprep.subr.bf16.mxu0 %v5385_v28 }
 0x105   : > { %5049 = vmatpush3.bf16.msra.mxu1 %v5388_v30 }
 0x106   : > { %736 = vmatpush1.bf16.msra.mxu0 %v5387_v29  ;;  %5050 = vmatprep.subr.bf16.mxu1 %v5796_v6 }
 0x107   : > { %737 = vmatprep.subr.bf16.mxu0 %v5389_v31 }
 0x109   : > { %5051 = vmatpush3.bf16.msra.mxu1 %v5392_v33 }
 0x10a   : > { %738 = vmatpush1.bf16.msra.mxu0 %v5391_v32  ;;  %5056 = vmatprep.subr.bf16.mxu1 %v5796_v6 }
 0x175   : > { %v533_v11 = vpop.xlane.xlu0 %532 }
 0x176   : > { %v535_v12 = vmul.f32 0.0078125, %v533_v11 }
 0x178   : > { %v536_v13 = vsub.f32 %v527_v3, %v535_v12  ;;  %v818_v3 = vunpack.c.0.s8 %v817_v62 }
 0x17a   : > { %v537_v14 = vmul.f32 %v536_v13, %v536_v13  ;;  %v6280_v8 = vsub.s32 %v818_v3, %v6257_v45 }
 0x17c   : > { %538 = vadd.xlane.f32.xlu0 %v537_v14  ;;  %v6283_v14 = vsub.s32 %v850_v7, %v6257_v45 }
 0x205   : > { %v539_v34 = vpop.xlane.xlu0 %538 }
 0x206   : > { %v540_v35 = vmul.f32 0.0078125, %v539_v34 }
 0x208   : > { %v541_v36 = vadd.f32 1e-05, %v540_v35 }
 0x20a   : > { %5401 = vrsqrt.f32 %v541_v36 }
 0x217   : > { %v5402_v37 = vpop.eup %5401 }
 0x218   : > { %v543_v39 = vmul.f32 %v5402_v37, %v536_v13 }
 0x21a   : > { %v544_v41 = vmul.f32 %v543_v39, %v528_v38 }
 0x21c   : > { %v545_v42 = vadd.f32 %v544_v41, %v529_v40 }
 0x21e   : > { %v546_v43 = vpack.c.bf16 %v545_v42, %v545_v42 }
 0x220   : > { %756 = vmatmul.mubr.bf16.vlgmr.msra.gmra.mxu0 %v546_v43  ;;  %5053 = vmatmul.mubr.bf16.vlgmr.msra.gmra.mxu1 %v546_v43 }
 0x221   : > { %5060 = vmatprep.mubr.msk.bf16.mxu1 %vm5798_vm0, %v5796_v6 }
 0x2e0   : > { %v757_v50 = vpop.f32.mrf.mxu0  ;;  %v6265_v51 = vpop.f32.mrf.mxu1 }
 0x2e1   : > { %v6270_v60 = vadd.f32 %v757_v50, %v583_v54 }
 0x2e2   : > { %v759_v52 = vpop.f32.mrf.mxu0  ;;  %v5054_v53 = vpop.f32.mrf.mxu1 }
 0x2e3   : > { %v760_v55 = vadd.f32 %v759_v52, %v587_v49 }
 0x2e4   : > { %v761_v56 = vpop.f32.mrf.mxu0  ;;  %v801_v57 = vpop.f32.mrf.mxu1 }
 0x2e5   : > { %897 = vrot.lane.b32.xlu0 %v760_v55, %s5799_s2  ;;  %891 = vrot.lane.b32.xlu1 %v760_v55, %s5800_s28 }
 0x2e6   : > { %v762_v58 = vpop.f32.mrf.mxu0  ;;  %v5055_v59 = vpop.f32.mrf.mxu1 }
 0x2e9   : > { %894 = vrot.lane.b32.xlu1 %v760_v55, %s5801_s21  ;;  %805 = vrot.lane.b32.xlu0 %v6270_v60, %s5800_s28 }
 0x2ed   : > { %808 = vrot.lane.b32.xlu1 %v6270_v60, %s5801_s21 }
 0x2f1   : > { %811 = vrot.lane.b32.xlu1 %v6270_v60, %s5799_s2 }
 0x357   : > { %v898_v4 = vpop.permute.xlu0 %897  ;;  %v892_v5 = vpop.permute.xlu1 %891 }
 0x358   : > { %v916_v9 = vcombine.low %v892_v5, %v898_v4  ;;  %v917_v10 = vcombine.high %v892_v5, %v898_v4 }
 0x35a   : > { %v924_v15 = vrot.slane %v916_v9, %v6280_v8  ;;  %v931_v16 = vrot.slane %v917_v10, %v6280_v8 }
 0x35b   : > { %v895_v11 = vpop.permute.xlu1 %894  ;;  %v6305_v49 = vpop.permute.xlu0 %805 }
 0x35c   : > { %v900_v12 = vcombine.low %v760_v55, %v895_v11  ;;  %v901_v13 = vcombine.high %v760_v55, %v895_v11 }
 0x35e   : > { %v908_v17 = vrot.slane %v900_v12, %v6280_v8  ;;  %v915_v18 = vrot.slane %v901_v13, %v6280_v8 }
 0x35f   : > { %v6297_v40 = vpop.permute.xlu1 %808 }
 0x360   : > { %v932_v19 = vcombine.low %v908_v17, %v924_v15  ;;  %v949_v20 = vcombine.high %v915_v18, %v931_v16  ;;  %v933_v21 = vcombine.high %v908_v17, %v924_v15  ;;  %v948_v29 = vcombine.low %v915_v18, %v931_v16 }
 0x362   : > { %v940_v22 = vrot.slane %v932_v19, %v6283_v14  ;;  %v963_v23 = vrot.slane %v949_v20, %v6283_v14  ;;  %v947_v27 = vrot.slane %v933_v21, %v6283_v14  ;;  %v956_v32 = vrot.slane %v948_v29, %v6283_v14 }
 0x363   : > { %v6299_v41 = vpop.permute.xlu1 %811 }
 0x364   : > { %v968_v24 = vpack.c.bf16 %v940_v22, %v940_v22  ;;  %v974_v26 = vpack.c.bf16 %v963_v23, %v963_v23  ;;  %v964_v28 = vcombine.high %v940_v22, %v5796_v6  ;;  %v970_v30 = vpack.c.bf16 %v947_v27, %v947_v27 }
 0x365   : > { %v972_v33 = vpack.c.bf16 %v956_v32, %v956_v32  ;;  %v965_v34 = vcombine.high %v947_v27, %v5796_v6  ;;  %v966_v36 = vcombine.high %v956_v32, %v5796_v6  ;;  %v967_v38 = vcombine.high %v963_v23, %v5796_v6 }
 0x366   : > { %1124 = vxpose.xlu1.c.b16.start.end [1/1] (short) (narrow) %v968_v24, 32  ;;  %1220 = vxpose.xlu0.c.b16.start.end [1/1] (short) (narrow) %v974_v26, 32  ;;  %v969_v31 = vpack.c.bf16 %v964_v28, %v964_v28 }
 0x367   : > { %v971_v35 = vpack.c.bf16 %v965_v34, %v965_v34  ;;  %v973_v37 = vpack.c.bf16 %v966_v36, %v966_v36  ;;  %v975_v39 = vpack.c.bf16 %v967_v38, %v967_v38 }
 0x36b   : > { %1156 = vxpose.xlu1.c.b16.start.end [1/1] (short) (narrow) %v970_v30, 32  ;;  %1140 = vxpose.xlu0.c.b16.start.end [1/1] (short) (narrow) %v969_v31, 32 }
 0x370   : > { %1188 = vxpose.xlu1.c.b16.start.end [1/1] (short) (narrow) %v972_v33, 32 }
 0x375   : > { %1172 = vxpose.xlu1.c.b16.start.end [1/1] (short) (narrow) %v971_v35, 32 }
 0x37a   : > { %1204 = vxpose.xlu1.c.b16.start.end [1/1] (short) (narrow) %v973_v37, 32 }
 0x37f   : > { %1236 = vxpose.xlu1.c.b16.start.end [1/1] (short) (narrow) %v975_v39, 32 }
 0x3c8   : > { %v1132_v42 = vpop.trf.xlu1  ;;  %v1228_v52 = vpop.trf.xlu0 }
 0x3c9   : > { %v1256_v4 = vshrl.u32 %v1132_v42, 16  ;;  %v1280_v5 = vshrl.u32 %v1228_v52, 16 }
 0x3cc   : > { %v6301_v43 = vpop.trf.xlu1  ;;  %v6311_v55 = vpop.trf.xlu0 }
 0x3d0   : > { %v1164_v44 = vpop.trf.xlu1  ;;  %v1148_v57 = vpop.trf.xlu0 }
 0x3d1   : > { %v1257_v62 = vshrl.u32 %v1148_v57, 16  ;;  %v1254_v0 = vpack.i.b16 %v1148_v57, %v1132_v42  ;;  %v1264_v7 = vshrl.u32 %v1164_v44, 16 }
 0x3d3   : > { %v1258_v16 = vpack.i.b16 %v1257_v62, %v1256_v4 }
 0x3d4   : > { %v6303_v46 = vpop.trf.xlu1 }
 0x3d8   : > { %v1196_v48 = vpop.trf.xlu1 }
 0x3d9   : > { %v1272_v63 = vshrl.u32 %v1196_v48, 16 }
 0x3dc   : > { %v6307_v50 = vpop.trf.xlu1 }
 0x3e0   : > { %v1180_v53 = vpop.trf.xlu1 }
 0x3e1   : > { %v1265_v3 = vshrl.u32 %v1180_v53, 16  ;;  %v1262_v11 = vpack.i.b16 %v1180_v53, %v1164_v44 }
 0x3e3   : > { %v1266_v17 = vpack.i.b16 %v1265_v3, %v1264_v7 }
 0x3e4   : > { %v6309_v54 = vpop.trf.xlu1 }
 0x3e8   : > { %v1212_v56 = vpop.trf.xlu1 }
 0x3e9   : > { %v1273_v58 = vshrl.u32 %v1212_v56, 16  ;;  %v1270_v61 = vpack.i.b16 %v1212_v56, %v1196_v48  ;;  %v1149_v48 = vpop.trf.xlu0  ;;  %v1294_v56 = vpack.i.b16 %v6309_v54, %v6303_v46 }
 0x3eb   : > { %v1274_v9 = vpack.i.b16 %v1273_v58, %v1272_v63  ;;  %v1316_v12 = vcombine.low %v1254_v0, %v1270_v61  ;;  %v1317_v26 = vcombine.high %v1254_v0, %v1270_v61  ;;  %v1286_v61 = vpack.i.b16 %v1149_v48, %v6301_v43 }
 0x3ec   : > { %v6313_v59 = vpop.trf.xlu1 }
 0x3ed   : > { %v1384_v20 = vcombine.low %v1258_v16, %v1274_v9  ;;  %v1324_v22 = vrot.slane %v1316_v12, %v6280_v8  ;;  %v1385_v36 = vcombine.high %v1258_v16, %v1274_v9  ;;  %v1331_v37 = vrot.slane %v1317_v26, %v6280_v8 }
 0x3ee   : > { %v1302_v57 = vpack.i.b16 %v6313_v59, %v6307_v50 }
 0x3ef   : > { %v1392_v28 = vrot.slane %v1384_v20, %v6280_v8  ;;  %v1399_v58 = vrot.slane %v1385_v36, %v6280_v8 }
 0x3f0   : > { %v1244_v10 = vpop.trf.xlu1  ;;  %v1453_v26 = vcombine.high %v1286_v61, %v1302_v57 }
 0x3f1   : > { %v1278_v13 = vpack.i.b16 %v1244_v10, %v1228_v52  ;;  %v1281_v15 = vshrl.u32 %v1244_v10, 16 }
 0x3f3   : > { %v1282_v18 = vpack.i.b16 %v1281_v15, %v1280_v5  ;;  %v1332_v19 = vcombine.low %v1262_v11, %v1278_v13  ;;  %v1333_v21 = vcombine.high %v1262_v11, %v1278_v13  ;;  %v1452_v5 = vcombine.low %v1286_v61, %v1302_v57 }
 0x3f4   : > { %v1245_v31 = vpop.trf.xlu1 }
 0x3f5   : > { %v1340_v23 = vrot.slane %v1332_v19, %v6280_v8  ;;  %v1400_v24 = vcombine.low %v1266_v17, %v1282_v18  ;;  %v1401_v30 = vcombine.high %v1266_v17, %v1282_v18  ;;  %v1347_v34 = vrot.slane %v1333_v21, %v6280_v8 }
 0x3f6   : > { %v1310_v38 = vpack.i.b16 %v1245_v31, %v6311_v55  ;;  %v1460_v12 = vrot.slane %v1452_v5, %v6280_v8  ;;  %v1313_v17 = vshrl.u32 %v1245_v31, 16  ;;  %v1312_v21 = vshrl.u32 %v6311_v55, 16 }
 0x3f7   : > { %v1348_v27 = vcombine.low %v1324_v22, %v1340_v23  ;;  %v1408_v29 = vrot.slane %v1400_v24, %v6280_v8  ;;  %v1349_v33 = vcombine.high %v1324_v22, %v1340_v23  ;;  %v1415_v44 = vrot.slane %v1401_v30, %v6280_v8 }
 0x3f8   : > { %v1364_v53 = vcombine.low %v1331_v37, %v1347_v34  ;;  %v1468_v62 = vcombine.low %v1294_v56, %v1310_v38  ;;  %v1365_v4 = vcombine.high %v1331_v37, %v1347_v34  ;;  %v1469_v19 = vcombine.high %v1294_v56, %v1310_v38 }
 0x3f9   : > { %v1356_v32 = vrot.slane %v1348_v27, %v6283_v14  ;;  %v1416_v35 = vcombine.low %v1392_v28, %v1408_v29  ;;  %v1417_v42 = vcombine.high %v1392_v28, %v1408_v29  ;;  %v1363_v52 = vrot.slane %v1349_v33, %v6283_v14 }
 0x3fa   : > { %v1432_v0 = vcombine.low %v1399_v58, %v1415_v44  ;;  %v1372_v3 = vrot.slane %v1364_v53, %v6283_v14  ;;  %v1433_v9 = vcombine.high %v1399_v58, %v1415_v44  ;;  %v1476_v10 = vrot.slane %v1468_v62, %v6280_v8 }
 0x3fb   : > { %1588 = vxpose.xlu1.c.b16.start.end [1/1] (short) (narrow) %v1356_v32, 16  ;;  %v1424_v39 = vrot.slane %v1416_v35, %v6283_v14  ;;  %v1431_v63 = vrot.slane %v1417_v42, %v6283_v14  ;;  %v6337_v11 = vrot.slane %v1365_v4, %v6283_v14  ;;  %v1380_v16 = vcombine.high %v1356_v32, %v5797_v25 }
 0x3fc   : > { %v1440_v7 = vrot.slane %v1432_v0, %v6283_v14  ;;  %v6342_v13 = vrot.slane %v1433_v9, %v6283_v14  ;;  %v1484_v15 = vcombine.low %v1460_v12, %v1476_v10  ;;  %v1381_v20 = vcombine.high %v1363_v52, %v5797_v25 }
 0x3fd   : > { %1604 = vxpose.xlu0.c.b16.start.end [1/1] (short) (narrow) %v1424_v39, 16  ;;  %v1297_v22 = vshrl.u32 %v6309_v54, 16  ;;  %v1305_v23 = vshrl.u32 %v6313_v59, 16  ;;  %v1296_v24 = vshrl.u32 %v6303_v46, 16  ;;  %v1289_v27 = vshrl.u32 %v1149_v48, 16 }
 0x3fe   : > { %v1492_v18 = vrot.slane %v1484_v15, %v6283_v14  ;;  %v1304_v28 = vshrl.u32 %v6307_v50, 16  ;;  %v1314_v29 = vpack.i.b16 %v1313_v17, %v1312_v21  ;;  %v1448_v30 = vcombine.high %v1424_v39, %v5797_v25 }
 0x3ff   : > { %1652 = vxpose.xlu1.c.b16.start.end [1/1] (short) (narrow) %v1363_v52, 16  ;;  %v1382_v31 = vcombine.high %v1372_v3, %v5797_v25  ;;  %v1485_v32 = vcombine.high %v1460_v12, %v1476_v10  ;;  %v1483_v55 = vrot.slane %v1469_v19, %v6280_v8  ;;  %v1288_v54 = vshrl.u32 %v6301_v43, 16 }
 0x400   : > { %v1298_v33 = vpack.i.b16 %v1297_v22, %v1296_v24  ;;  %v1306_v59 = vpack.i.b16 %v1305_v23, %v1304_v28  ;;  %v1467_v46 = vrot.slane %v1453_v26, %v6280_v8  ;;  %v1449_v35 = vcombine.high %v1431_v63, %v5797_v25 }
 0x401   : > { %1668 = vxpose.xlu0.c.b16.start.end [1/1] (short) (narrow) %v1431_v63, 16  ;;  %v1290_v34 = vpack.i.b16 %v1289_v27, %v1288_v54  ;;  %v1499_v36 = vrot.slane %v1485_v32, %v6283_v14  ;;  %v1450_v39 = vcombine.high %v1440_v7, %v5797_v25  ;;  %v1516_v56 = vcombine.high %v1492_v18, %v5797_v25 }
 0x402   : > { %v1536_v50 = vcombine.low %v1298_v33, %v1314_v29  ;;  %v1500_v37 = vcombine.low %v1467_v46, %v1483_v55  ;;  %v1537_v42 = vcombine.high %v1298_v33, %v1314_v29  ;;  %v1501_v48 = vcombine.high %v1467_v46, %v1483_v55 }
 0x403   : > { %1716 = vxpose.xlu1.c.b16.start.end [1/1] (short) (narrow) %v1372_v3, 16  ;;  %v1520_v38 = vcombine.low %v1290_v34, %v1306_v59  ;;  %v1521_v53 = vcombine.high %v1290_v34, %v1306_v59  ;;  %v1517_v9 = vcombine.high %v1499_v36, %v5797_v25 }
 0x404   : > { %v1544_v43 = vrot.slane %v1536_v50, %v6280_v8  ;;  %v1508_v44 = vrot.slane %v1500_v37, %v6283_v14  ;;  %v1551_v58 = vrot.slane %v1537_v42, %v6280_v8  ;;  %v1515_v61 = vrot.slane %v1501_v48, %v6283_v14 }
 0x405   : > { %1732 = vxpose.xlu0.c.b16.start.end [1/1] (short) (narrow) %v1440_v7, 16  ;;  %v1528_v52 = vrot.slane %v1520_v38, %v6280_v8  ;;  %v1535_v63 = vrot.slane %v1521_v53, %v6280_v8  ;;  %v830_v37 = vcombine.low %v6305_v49, %v6299_v41  ;;  %v831_v38 = vcombine.high %v6305_v49, %v6299_v41 }
 0x406   : > { %v1518_v12 = vcombine.high %v1508_v44, %v5797_v25  ;;  %v1519_v17 = vcombine.high %v1515_v61, %v5797_v25 }
 0x407   : > { %1780 = vxpose.xlu1.c.b16.start.end [1/1] (short) (narrow) %v6337_v11, 16  ;;  %v1553_v57 = vcombine.high %v1528_v52, %v1544_v43  ;;  %v1552_v62 = vcombine.low %v1528_v52, %v1544_v43  ;;  %v1568_v3 = vcombine.low %v1535_v63, %v1551_v58  ;;  %v1569_v7 = vcombine.high %v1535_v63, %v1551_v58 }
 0x408   : > { %v815_v43 = vcombine.high %v6270_v60, %v6297_v40  ;;  %v838_v48 = vrot.slane %v830_v37, %v6280_v8  ;;  %v845_v52 = vrot.slane %v831_v38, %v6280_v8 }
 0x409   : > { %1796 = vxpose.xlu0.c.b16.start.end [1/1] (short) (narrow) %v6342_v13, 16  ;;  %v1567_v0 = vrot.slane %v1553_v57, %v6283_v14  ;;  %v1560_v4 = vrot.slane %v1552_v62, %v6283_v14  ;;  %v1576_v5 = vrot.slane %v1568_v3, %v6283_v14  ;;  %v1583_v10 = vrot.slane %v1569_v7, %v6283_v14 }
 0x40b   : > { %1620 = vxpose.xlu1.c.b16.start.end [1/1] (short) (narrow) %v1380_v16, 16  ;;  %v1584_v15 = vcombine.high %v1560_v4, %v5797_v25  ;;  %v590_v16 = vsub.s32 2, %v6257_v45  ;;  %v1586_v21 = vcombine.high %v1576_v5, %v5797_v25  ;;  %v1587_v45 = vcombine.high %v1583_v10, %v5797_v25 }
 0x40d   : > { %1844 = vxpose.xlu0.c.b16.start.end [1/1] (short) (narrow) %v1492_v18, 16  ;;  %v1585_v18 = vcombine.high %v1567_v0, %v5797_v25  ;;  %v591_v19 = vrot.slane %v6261_v47, %v590_v16  ;;  %v1451_v47 = vcombine.high %v6342_v13, %v5797_v25 }
 0x40f   : > { %1684 = vxpose.xlu1.c.b16.start.end [1/1] (short) (narrow) %v1381_v20, 16  ;;  %v1383_v20 = vcombine.high %v6337_v11, %v5797_v25  ;;  %v6383_v22 = vadd.f32 %v6265_v51, %v591_v19 }
 0x411   : > { %1636 = vxpose.xlu0.c.b16.start.end [1/1] (short) (narrow) %v1448_v30, 16 }
 0x413   : > { %1748 = vxpose.xlu1.c.b16.start.end [1/1] (short) (narrow) %v1382_v31, 16 }
 0x415   : > { %1700 = vxpose.xlu0.c.b16.start.end [1/1] (short) (narrow) %v1449_v35, 16 }
 0x417   : > { %1908 = vxpose.xlu1.c.b16.start.end [1/1] (short) (narrow) %v1499_v36, 16 }
 0x419   : > { %1764 = vxpose.xlu0.c.b16.start.end [1/1] (short) (narrow) %v1450_v39, 16  ;;  %v814_v39 = vcombine.low %v6270_v60, %v6297_v40 }
 0x41b   : > { %1972 = vxpose.xlu1.c.b16.start.end [1/1] (short) (narrow) %v1508_v44, 16  ;;  %v822_v53 = vrot.slane %v814_v39, %v6280_v8 }
 0x41d   : > { %1876 = vxpose.xlu0.c.b16.start.end [1/1] (short) (narrow) %v1516_v56, 16  ;;  %v829_v56 = vrot.slane %v815_v43, %v6280_v8  ;;  %v847_v49 = vcombine.high %v822_v53, %v838_v48 }
 0x41f   : > { %2036 = vxpose.xlu1.c.b16.start.end [1/1] (short) (narrow) %v1515_v61, 16  ;;  %v846_v61 = vcombine.low %v822_v53, %v838_v48  ;;  %v862_v41 = vcombine.low %v829_v56, %v845_v52  ;;  %v863_v62 = vcombine.high %v829_v56, %v845_v52  ;;  %v861_v3 = vrot.slane %v847_v49, %v6283_v14 }
 0x421   : > { %1924 = vxpose.xlu0.c.b16.start.end [1/1] (short) (narrow) %v1567_v0, 16  ;;  %v6435_v60 = vrot.slane %v846_v61, %v6283_v14  ;;  %v870_v40 = vrot.slane %v862_v41, %v6283_v14 }
 0x423   : > { %1860 = vxpose.xlu1.c.b16.start.end [1/1] (short) (narrow) %v1560_v4, 16  ;;  %v877_v4 = vrot.slane %v863_v62, %v6283_v14 }
 0x425   : > { %1988 = vxpose.xlu0.c.b16.start.end [1/1] (short) (narrow) %v1576_v5, 16  ;;  %v881_v19 = vcombine.high %v877_v4, %v5796_v6  ;;  %v4924_v56 = vpack.c.bf16 %v877_v4, %v861_v3 }
 0x427   : > { %1940 = vxpose.xlu1.c.b16.start.end [1/1] (short) (narrow) %v1517_v9, 16  ;;  %v878_v9 = vcombine.high %v6435_v60, %v5796_v6 }
 0x429   : > { %2052 = vxpose.xlu0.c.b16.start.end [1/1] (short) (narrow) %v1583_v10, 16  ;;  %v880_v10 = vcombine.high %v870_v40, %v5796_v6 }
 0x42b   : > { %2004 = vxpose.xlu1.c.b16.start.end [1/1] (short) (narrow) %v1518_v12, 16  ;;  %v4925_v39 = vpack.c.bf16 %v880_v10, %v878_v9  ;;  %v1077_v10 = vrot.slane %v4924_v56, %v6280_v8 }
 0x42d   : > { %1892 = vxpose.xlu0.c.b16.start.end [1/1] (short) (narrow) %v1584_v15, 16 }
 0x42f   : > { %2068 = vxpose.xlu1.c.b16.start.end [1/1] (short) (narrow) %v1519_v17, 16 }
 0x431   : > { %1956 = vxpose.xlu0.c.b16.start.end [1/1] (short) (narrow) %v1585_v18, 16  ;;  %v879_v18 = vcombine.high %v861_v3, %v5796_v6 }
 0x433   : > { %1812 = vxpose.xlu1.c.b16.start.end [1/1] (short) (narrow) %v1383_v20, 16 }
 0x435   : > { %2020 = vxpose.xlu0.c.b16.start.end [1/1] (short) (narrow) %v1586_v21, 16 }
 0x437   : > { %977 = vrot.lane.b32.xlu1 %v6383_v22, %s5800_s28 }
 0x439   : > { %2084 = vxpose.xlu0.c.b16.start.end [1/1] (short) (narrow) %v1587_v45, 16  ;;  %v4923_v45 = vpack.c.bf16 %v870_v40, %v6435_v60 }
 0x43b   : > { %983 = vrot.lane.b32.xlu1 %v6383_v22, %s5799_s2  ;;  %v1069_v9 = vrot.slane %v4923_v45, %v6280_v8 }
 0x43d   : > { %1828 = vxpose.xlu0.c.b16.start.end [1/1] (short) (narrow) %v1451_v47, 16 }
 0x446   : > { %980 = vrot.lane.b32.xlu0 %v6383_v22, %s5801_s21 }
 0x45d   : > { %v6394_v11 = vpop.trf.xlu1 }
 0x45f   : > { %v6396_v51 = vpop.trf.xlu0 }
 0x461   : > { %v6398_v23 = vpop.trf.xlu1 }
 0x463   : > { %v6400_v24 = vpop.trf.xlu0 }
 0x465   : > { %v6402_v26 = vpop.trf.xlu1 }
 0x467   : > { %v6404_v27 = vpop.trf.xlu0 }
 0x469   : > { %v6406_v28 = vpop.trf.xlu1 }
 0x46a   : > { %v2116_v43 = vcombine.low %v6402_v26, %v6406_v28  ;;  %v2150_v26 = vcombine.low %v6396_v51, %v6400_v24 }
 0x46b   : > { %v6408_v29 = vpop.trf.xlu0 }
 0x46c   : > { %v2166_v48 = vcombine.low %v6404_v27, %v6408_v29  ;;  %v2157_v61 = vrot.slane %v2150_v26, %v6280_v8 }
 0x46d   : > { %v6410_v13 = vpop.trf.xlu1 }
 0x46f   : > { %v1852_v30 = vpop.trf.xlu0 }
 0x471   : > { %v6412_v31 = vpop.trf.xlu1 }
 0x473   : > { %v6414_v32 = vpop.trf.xlu0 }
 0x475   : > { %v6416_v55 = vpop.trf.xlu1 }
 0x477   : > { %v6418_v54 = vpop.trf.xlu0 }
 0x479   : > { %v1916_v33 = vpop.trf.xlu1 }
 0x47a   : > { %v2200_v20 = vcombine.low %v1852_v30, %v1916_v33 }
 0x47b   : > { %v6420_v59 = vpop.trf.xlu0 }
 0x47c   : > { %v2207_v28 = vrot.slane %v2200_v20, %v6280_v8 }
 0x47d   : > { %v1980_v46 = vpop.trf.xlu1 }
 0x47f   : > { %v1884_v34 = vpop.trf.xlu0 }
 0x481   : > { %v2044_v35 = vpop.trf.xlu1 }
 0x482   : > { %v2216_v15 = vcombine.low %v1980_v46, %v2044_v35  ;;  %v2108_v46 = vcombine.low %v6410_v13, %v6412_v31 }
 0x483   : > { %v1932_v50 = vpop.trf.xlu0 }
 0x484   : > { %v2223_v30 = vrot.slane %v2216_v15, %v6280_v8  ;;  %v2115_v52 = vrot.slane %v2108_v46, %v6280_v8 }
 0x485   : > { %v1868_v36 = vpop.trf.xlu1 }
 0x486   : > { %v2250_v47 = vcombine.low %v1868_v36, %v1932_v50  ;;  %v4926_v36 = vpack.c.bf16 %v881_v19, %v879_v18 }
 0x487   : > { %v1996_v42 = vpop.trf.xlu0 }
 0x488   : > { %v2257_v31 = vrot.slane %v2250_v47, %v6280_v8  ;;  %v1078_v47 = vcombine.low %v1069_v9, %v1077_v10 }
 0x489   : > { %v1948_v44 = vpop.trf.xlu1 }
 0x48a   : > { %v2208_v16 = vcombine.low %v1884_v34, %v1948_v44  ;;  %v2158_v34 = vcombine.low %v6414_v32, %v6418_v54  ;;  %v1085_v46 = vrot.slane %v1078_v47, %v6283_v14 }
 0x48b   : > { %v2060_v57 = vpop.trf.xlu0 }
 0x48c   : > { %v2215_v33 = vrot.slane %v2208_v16, %v6280_v8  ;;  %v2266_v35 = vcombine.low %v1996_v42, %v2060_v57  ;;  %v2123_v42 = vrot.slane %v2116_v43, %v6280_v8  ;;  %v1094_v57 = vrot.slane %v4925_v39, %v6280_v8 }
 0x48d   : > { %v2012_v58 = vpop.trf.xlu1 }
 0x48e   : > { %v2273_v51 = vrot.slane %v2266_v35, %v6280_v8 }
 0x48f   : > { %v1900_v63 = vpop.trf.xlu0 }
 0x491   : > { %v2076_v0 = vpop.trf.xlu1 }
 0x492   : > { %v2224_v7 = vcombine.low %v2012_v58, %v2076_v0  ;;  %v2173_v0 = vrot.slane %v2166_v48, %v6280_v8 }
 0x493   : > { %v1964_v5 = vpop.trf.xlu0 }
 0x494   : > { %v2258_v17 = vcombine.low %v1900_v63, %v1964_v5  ;;  %v2231_v37 = vrot.slane %v2224_v7, %v6280_v8  ;;  %v1102_v63 = vrot.slane %v4926_v36, %v6280_v8 }
 0x495   : > { %v1820_v12 = vpop.trf.xlu1 }
 0x496   : > { %v2124_v38 = vcombine.low %v6416_v55, %v1820_v12  ;;  %v2265_v50 = vrot.slane %v2258_v17, %v6280_v8  ;;  %v2100_v55 = vcombine.low %v6394_v11, %v6398_v23  ;;  %v2240_v32 = vcombine.low %v2223_v30, %v2231_v37 }
 0x497   : > { %v2028_v21 = vpop.trf.xlu0  ;;  %v2165_v11 = vrot.slane %v2158_v34, %v6280_v8  ;;  %v2232_v23 = vcombine.low %v2207_v28, %v2215_v33  ;;  %v1103_v17 = vcombine.low %v1094_v57, %v1102_v63 }
 0x498   : > { %v2131_v54 = vrot.slane %v2124_v38, %v6280_v8  ;;  %v2282_v24 = vcombine.low %v2257_v31, %v2265_v50  ;;  %v2107_v58 = vrot.slane %v2100_v55, %v6280_v8  ;;  %v2247_v27 = vrot.slane %v2240_v32, %v6283_v14 }
 0x499   : > { %v2182_v40 = vcombine.low %v2157_v61, %v2165_v11  ;;  %v2239_v3 = vrot.slane %v2232_v23, %v6283_v14  ;;  %v1110_v45 = vrot.slane %v1103_v17, %v6283_v14 }
 0x49a   : > { %v2140_v29 = vcombine.low %v2123_v42, %v2131_v54  ;;  %v2132_v60 = vcombine.low %v2107_v58, %v2115_v52  ;;  %v2289_v4 = vrot.slane %v2282_v24, %v6283_v14 }
 0x49b   : > { %v2092_v13 = vpop.trf.xlu0  ;;  %v2248_v12 = vcombine.low %v2239_v3, %v2247_v27  ;;  %v2189_v19 = vrot.slane %v2182_v40, %v6283_v14  ;;  %v1114_v30 = vpack.i.b16 %v1110_v45, %v1085_v46  ;;  %v1116_v55 = vshrl.u32 %v1110_v45, 16 }
 0x49c   : > { %v2274_v44 = vcombine.low %v2028_v21, %v2092_v13  ;;  %v2139_v18 = vrot.slane %v2132_v60, %v6283_v14  ;;  %v1115_v13 = vshrl.u32 %v1085_v46, 16  ;;  %v2249_v31 = vcombine.high %v2239_v3, %v2247_v27 }
 0x49d   : > { %v2320_v34 = vshrl.u32 %v2248_v12, 16  ;;  %v1086_v27 = vcombine.high %v1085_v46, %v5797_v25 }
 0x49e   : > { %v2281_v53 = vrot.slane %v2274_v44, %v6280_v8  ;;  %v1117_v54 = vpack.i.b16 %v1116_v55, %v1115_v13 }
 0x49f   : > { %v1836_v41 = vpop.trf.xlu0 }
 0x4a0   : > { %v2290_v49 = vcombine.low %v2273_v51, %v2281_v53  ;;  %v2174_v62 = vcombine.low %v6420_v59, %v1836_v41  ;;  %v2147_v59 = vrot.slane %v2140_v29, %v6283_v14  ;;  %v1111_v53 = vcombine.high %v1110_v45, %v5797_v25 }
 0x4a1   : > { %v2328_v29 = vshrl.u32 %v2249_v31, 16 }
 0x4a2   : > { %v2297_v5 = vrot.slane %v2290_v49, %v6283_v14  ;;  %v2181_v7 = vrot.slane %v2174_v62, %v6280_v8  ;;  %v2148_v37 = vcombine.low %v2139_v18, %v2147_v59  ;;  %v2149_v52 = vcombine.high %v2139_v18, %v2147_v59 }
 0x4a3   : > { %v1120_v63 = vpack.i.b16 %v1111_v53, %v1086_v27  ;;  %v1122_v10 = vshrl.u32 %v1111_v53, 16 }
 0x4a4   : > { %v2298_v15 = vcombine.low %v2289_v4, %v2297_v5  ;;  %v2190_v16 = vcombine.low %v2173_v0, %v2181_v7  ;;  %v2304_v36 = vshrl.u32 %v2148_v37, 16  ;;  %v2299_v26 = vcombine.high %v2289_v4, %v2297_v5 }
 0x4a5   : > { %v2312_v5 = vshrl.u32 %v2149_v52, 16 }
 0x4a6   : > { %v2197_v20 = vrot.slane %v2190_v16, %v6283_v14  ;;  %v2318_v21 = vpack.i.b16 %v2298_v15, %v2248_v12  ;;  %v2321_v43 = vshrl.u32 %v2298_v15, 16  ;;  %v2326_v42 = vpack.i.b16 %v2299_v26, %v2249_v31 }
 0x4a7   : > { %v2329_v57 = vshrl.u32 %v2299_v26, 16  ;;  %v1121_v16 = vshrl.u32 %v1086_v27, 16 }
 0x4a8   : > { %v2198_v38 = vcombine.low %v2189_v19, %v2197_v20  ;;  %5057 = vmatpush3.bf16.msra.mxu1 %v2318_v21  ;;  %v2322_v35 = vpack.i.b16 %v2321_v43, %v2320_v34  ;;  %v2199_v44 = vcombine.high %v2189_v19, %v2197_v20  ;;  %v6520_v21 = vld [vmem:[#allocation3] sm:$0xff] }
 0x4a9   : > { %5058 = vmatprep.subr.bf16.mxu1 %v5796_v6  ;;  %v978_v33 = vpop.permute.xlu1 %977  ;;  %v2330_v0 = vpack.i.b16 %v2329_v57, %v2328_v29  ;;  %v1123_v19 = vpack.i.b16 %v1122_v10, %v1121_v16 }
 0x4aa   : > { %v2302_v39 = vpack.i.b16 %v2198_v38, %v2148_v37  ;;  %v2305_v50 = vshrl.u32 %v2198_v38, 16  ;;  %v2310_v56 = vpack.i.b16 %v2199_v44, %v2149_v52  ;;  %v2313_v60 = vshrl.u32 %v2199_v44, 16 }
 0x4ac   : > { %5059 = vmatpush3.bf16.msra.mxu1 %v2302_v39  ;;  %v2306_v28 = vpack.i.b16 %v2305_v50, %v2304_v36  ;;  %v2314_v12 = vpack.i.b16 %v2313_v60, %v2312_v5 }
 0x4ad   : > { %5064 = vmatprep.subr.bf16.mxu1 %v5796_v6  ;;  %v984_v32 = vpop.permute.xlu1 %983 }
 0x4ae   : > { %v1002_v48 = vcombine.low %v978_v33, %v984_v32  ;;  %v1003_v23 = vcombine.high %v978_v33, %v984_v32 }
 0x4af   : > { %5061 = vmatmul.mubr.msk.bf16.vlgmr.msra.gmra.mxu1 %vm2332_vm1, %v1114_v30 }
 0x4b0   : > { %5065 = vmatpush3.bf16.msra.mxu1 %v2322_v35  ;;  %5068 = vmatprep.mubr.msk.bf16.mxu1 %vm5798_vm0, %v5796_v6  ;;  %v1010_v58 = vrot.slane %v1002_v48, %v6280_v8  ;;  %v1017_v49 = vrot.slane %v1003_v23, %v6280_v8 }
 0x4b1   : > { %5066 = vmatprep.subr.bf16.mxu1 %v5796_v6 }
 0x4b4   : > { %5067 = vmatpush3.bf16.msra.mxu1 %v2306_v28 }
 0x4b5   : > { %5072 = vmatprep.subr.bf16.mxu1 %v5796_v6 }
 0x4b7   : > { %5069 = vmatmul.mubr.msk.bf16.vlgmr.msra.gmra.mxu1 %vm2332_vm1, %v1117_v54 }
 0x4b8   : > { %5073 = vmatpush3.bf16.msra.mxu1 %v2326_v42  ;;  %v981_v11 = vpop.permute.xlu0 %980  ;;  %5076 = vmatprep.mubr.msk.bf16.mxu1 %vm5798_vm0, %v5796_v6 }
 0x4b9   : > { %v986_v51 = vcombine.low %v6383_v22, %v981_v11  ;;  %v987_v24 = vcombine.high %v6383_v22, %v981_v11  ;;  %5074 = vmatprep.subr.bf16.mxu1 %v5796_v6 }
 0x4bb   : > { %v994_v61 = vrot.slane %v986_v51, %v6280_v8  ;;  %v1001_v41 = vrot.slane %v987_v24, %v6280_v8 }
 0x4bc   : > { %5075 = vmatpush3.bf16.msra.mxu1 %v2310_v56 }
 0x4bd   : > { %v1018_v62 = vcombine.low %v994_v61, %v1010_v58  ;;  %v1019_v22 = vcombine.high %v994_v61, %v1010_v58  ;;  %5080 = vmatprep.subr.bf16.mxu1 %v5796_v6  ;;  %v1034_v40 = vcombine.low %v1001_v41, %v1017_v49  ;;  %v1035_v18 = vcombine.high %v1001_v41, %v1017_v49 }
 0x4bf   : > { %5077 = vmatmul.mubr.msk.bf16.vlgmr.msra.gmra.mxu1 %vm2332_vm1, %v1120_v63  ;;  %v1026_v3 = vrot.slane %v1018_v62, %v6283_v14  ;;  %v1033_v4 = vrot.slane %v1019_v22, %v6283_v14  ;;  %v1042_v17 = vrot.slane %v1034_v40, %v6283_v14 }
 0x4c0   : > { %5081 = vmatpush3.bf16.msra.mxu1 %v2330_v0  ;;  %5084 = vmatprep.mubr.msk.bf16.mxu1 %vm5798_vm0, %v5796_v6 }
 0x4c1   : > { %5082 = vmatprep.subr.bf16.mxu1 %v5796_v6  ;;  %v1054_v7 = vpack.c.bf16 %v1026_v3, %v1026_v3  ;;  %v1050_v9 = vcombine.high %v1026_v3, %v5796_v6  ;;  %v1051_v59 = vcombine.high %v1033_v4, %v5796_v6  ;;  %v1052_v47 = vcombine.high %v1042_v17, %v6520_v21 }
 0x4c2   : > { %v1056_v37 = vpack.c.bf16 %v1033_v4, %v1033_v4  ;;  %v1049_v6 = vrot.slane %v1035_v18, %v6283_v14  ;;  %v1058_v39 = vpack.c.bf16 %v1042_v17, %v1042_v17 }
 0x4c3   : > { %2554 = vxpose.xlu1.c.b16.start.end [1/1] (short) (narrow) %v1054_v7, 32  ;;  %v1055_v15 = vpack.c.bf16 %v1050_v9, %v1050_v9  ;;  %v1057_v20 = vpack.c.bf16 %v1051_v59, %v1051_v59  ;;  %v1059_v38 = vpack.c.bf16 %v1052_v47, %v1052_v47 }
 0x4c4   : > { %5083 = vmatpush3.bf16.msra.mxu1 %v2314_v12  ;;  %v1053_v45 = vcombine.high %v1049_v6, %v6520_v21  ;;  %v1060_v46 = vpack.c.bf16 %v1049_v6, %v1049_v6 }
 0x4c5   : > { %2570 = vxpose.xlu0.c.b16.start.end [1/1] (short) (narrow) %v1055_v15, 32 }
 0x4c6   : > { %v1061_v43 = vpack.c.bf16 %v1053_v45, %v1053_v45 }
 0x4c7   : > { %5085 = vmatmul.mubr.msk.bf16.vlgmr.msra.gmra.mxu1 %vm2332_vm1, %v1123_v19 }
 0x4c8   : > { %2602 = vxpose.xlu1.c.b16.start.end [1/1] (short) (narrow) %v1057_v20, 32 }
 0x4ca   : > { %2586 = vxpose.xlu0.c.b16.start.end [1/1] (short) (narrow) %v1056_v37, 32 }
 0x4cd   : > { %2634 = vxpose.xlu1.c.b16.start.end [1/1] (short) (narrow) %v1059_v38, 32 }
 0x4cf   : > { %2618 = vxpose.xlu0.c.b16.start.end [1/1] (short) (narrow) %v1058_v39, 32 }
 0x4d2   : > { %2666 = vxpose.xlu1.c.b16.start.end [1/1] (short) (narrow) %v1061_v43, 32 }
 0x4d4   : > { %2650 = vxpose.xlu0.c.b16.start.end [1/1] (short) (narrow) %v1060_v46, 32 }
 0x525   : > { %v2562_v34 = vpop.trf.xlu1 }
 0x526   : > { %v2686_v41 = vshrl.u32 %v2562_v34, 16 }
 0x527   : > { %v2578_v30 = vpop.trf.xlu0 }
 0x528   : > { %v6535_v27 = vpack.i.b16 %v2578_v30, %v2562_v34  ;;  %v2687_v29 = vshrl.u32 %v2578_v30, 16 }
 0x529   : > { %v2563_v33 = vpop.trf.xlu1 }
 0x52a   : > { %v2718_v35 = vshrl.u32 %v2563_v33, 16  ;;  %v6547_v59 = vpack.i.b16 %v2687_v29, %v2686_v41 }
 0x52b   : > { %v2579_v50 = vpop.trf.xlu0 }
 0x52c   : > { %v6525_v36 = vpack.i.b16 %v2579_v50, %v2563_v33  ;;  %v2719_v55 = vshrl.u32 %v2579_v50, 16 }
 0x52d   : > { %v2610_v26 = vpop.trf.xlu1 }
 0x52e   : > { %v6527_v28 = vpack.i.b16 %v2719_v55, %v2718_v35  ;;  %v2695_v62 = vshrl.u32 %v2610_v26, 16 }
 0x52f   : > { %v2594_v13 = vpop.trf.xlu0 }
 0x530   : > { %v2692_v60 = vpack.i.b16 %v2610_v26, %v2594_v13  ;;  %v2694_v40 = vshrl.u32 %v2594_v13, 16 }
 0x531   : > { %v2611_v31 = vpop.trf.xlu1 }
 0x532   : > { %v2727_v32 = vshrl.u32 %v2611_v31, 16  ;;  %v2696_v18 = vpack.i.b16 %v2695_v62, %v2694_v40 }
 0x533   : > { %v2595_v54 = vpop.trf.xlu0 }
 0x534   : > { %v6529_v44 = vpack.i.b16 %v2611_v31, %v2595_v54  ;;  %v2726_v42 = vshrl.u32 %v2595_v54, 16 }
 0x535   : > { %v2642_v48 = vpop.trf.xlu1 }
 0x536   : > { %v2728_v52 = vpack.i.b16 %v2727_v32, %v2726_v42  ;;  %v2703_v24 = vshrl.u32 %v2642_v48, 16 }
 0x537   : > { %v2626_v11 = vpop.trf.xlu0 }
 0x538   : > { %v2702_v53 = vshrl.u32 %v2626_v11, 16  ;;  %v6531_v57 = vpack.i.b16 %v2642_v48, %v2626_v11 }
 0x539   : > { %v2643_v23 = vpop.trf.xlu1 }
 0x53a   : > { %v2735_v51 = vshrl.u32 %v2643_v23, 16  ;;  %v6541_v3 = vpack.i.b16 %v2703_v24, %v2702_v53  ;;  %v2746_v7 = vcombine.low %v6535_v27, %v6531_v57 }
 0x53b   : > { %v2627_v56 = vpop.trf.xlu0 }
 0x53c   : > { %v6533_v58 = vpack.i.b16 %v2643_v23, %v2627_v56  ;;  %v2734_v61 = vshrl.u32 %v2627_v56, 16  ;;  %v2814_v19 = vcombine.low %v6547_v59, %v6541_v3  ;;  %v2754_v45 = vrot.slane %v2746_v7, %v6280_v8 }
 0x53d   : > { %v2674_v49 = vpop.trf.xlu1  ;;  %v2747_v56 = vcombine.high %v6535_v27, %v6531_v57  ;;  %v2815_v27 = vcombine.high %v6547_v59, %v6541_v3 }
 0x53e   : > { %v2736_v22 = vpack.i.b16 %v2735_v51, %v2734_v61  ;;  %v2882_v63 = vcombine.low %v6525_v36, %v6533_v58  ;;  %v2883_v0 = vcombine.high %v6525_v36, %v6533_v58  ;;  %v2711_v4 = vshrl.u32 %v2674_v49, 16 }
 0x53f   : > { %v2658_v5 = vpop.trf.xlu0  ;;  %v2822_v35 = vrot.slane %v2814_v19, %v6280_v8 }
 0x540   : > { %v2950_v9 = vcombine.low %v6527_v28, %v2736_v22  ;;  %v2951_v10 = vcombine.high %v6527_v28, %v2736_v22  ;;  %v2708_v12 = vpack.i.b16 %v2674_v49, %v2658_v5  ;;  %v2710_v15 = vshrl.u32 %v2658_v5, 16 }
 0x541   : > { %v2675_v16 = vpop.trf.xlu1  ;;  %v6568_v54 = vrot.slane %v2882_v63, %v6280_v8  ;;  %v6594_v63 = vrot.slane %v2883_v0, %v6280_v8 }
 0x542   : > { %v2762_v17 = vcombine.low %v2692_v60, %v2708_v12  ;;  %v2712_v20 = vpack.i.b16 %v2711_v4, %v2710_v15  ;;  %v2743_v47 = vshrl.u32 %v2675_v16, 16  ;;  %v6562_v31 = vrot.slane %v2950_v9, %v6280_v8 }
 0x543   : > { %v2659_v37 = vpop.trf.xlu0  ;;  %v2763_v48 = vcombine.high %v2692_v60, %v2708_v12  ;;  %v6578_v51 = vrot.slane %v2951_v10, %v6280_v8  ;;  %v2761_v60 = vrot.slane %v2747_v56, %v6280_v8  ;;  %v2829_v10 = vrot.slane %v2815_v27, %v6280_v8 }
 0x544   : > { %v2740_v6 = vpack.i.b16 %v2675_v16, %v2659_v37  ;;  %v2742_v38 = vshrl.u32 %v2659_v37, 16  ;;  %v2770_v39 = vrot.slane %v2762_v17, %v6280_v8  ;;  %v2830_v43 = vcombine.low %v2696_v18, %v2712_v20 }
 0x545   : > { %v2831_v58 = vcombine.high %v2696_v18, %v2712_v20  ;;  %v2777_v22 = vrot.slane %v2763_v48, %v6280_v8 }
 0x546   : > { %v2744_v46 = vpack.i.b16 %v2743_v47, %v2742_v38  ;;  %v2898_v34 = vcombine.low %v6529_v44, %v2740_v6  ;;  %v2899_v30 = vcombine.high %v6529_v44, %v2740_v6  ;;  %v2778_v33 = vcombine.low %v2754_v45, %v2770_v39 }
 0x547   : > { %v2838_v50 = vrot.slane %v2830_v43, %v6280_v8  ;;  %v2779_v11 = vcombine.high %v2754_v45, %v2770_v39  ;;  %v2845_v7 = vrot.slane %v2831_v58, %v6280_v8  ;;  %v2794_v3 = vcombine.low %v2761_v60, %v2777_v22 }
 0x548   : > { %v2966_v36 = vcombine.low %v2728_v52, %v2744_v46  ;;  %v2967_v55 = vcombine.high %v2728_v52, %v2744_v46  ;;  %v2786_v26 = vrot.slane %v2778_v33, %v6283_v14  ;;  %v6559_v28 = vrot.slane %v2898_v34, %v6280_v8 }
 0x549   : > { %v2846_v13 = vcombine.low %v2822_v35, %v2838_v50  ;;  %v2847_v41 = vcombine.high %v2822_v35, %v2838_v50  ;;  %v2793_v62 = vrot.slane %v2779_v11, %v6283_v14  ;;  %v6597_v57 = vrot.slane %v2899_v30, %v6280_v8 }
 0x54a   : > { %v6565_v32 = vrot.slane %v2966_v36, %v6280_v8  ;;  %3018 = vxpose.xlu0.c.b16.start.end [1/1] (short) (narrow) %v2786_v26, 16  ;;  %v6571_v44 = vrot.slane %v2967_v55, %v6280_v8  ;;  %v2810_v52 = vcombine.high %v2786_v26, %v5797_v25  ;;  %v2914_v24 = vcombine.low %v6568_v54, %v6559_v28 }
 0x54b   : > { %v2854_v42 = vrot.slane %v2846_v13, %v6283_v14  ;;  %v2915_v29 = vcombine.high %v6568_v54, %v6559_v28  ;;  %v2930_v40 = vcombine.low %v6594_v63, %v6597_v57  ;;  %v2931_v0 = vcombine.high %v6594_v63, %v6597_v57 }
 0x54c   : > { %v2982_v23 = vcombine.low %v6562_v31, %v6565_v32  ;;  %v2983_v53 = vcombine.high %v6562_v31, %v6565_v32  ;;  %v2998_v49 = vcombine.low %v6578_v51, %v6571_v44  ;;  %v2999_v4 = vcombine.high %v6578_v51, %v6571_v44 }
 0x54d   : > { %3034 = vxpose.xlu1.c.b16.start.end [1/1] (short) (narrow) %v2854_v42, 16  ;;  %v2878_v61 = vcombine.high %v2854_v42, %v5797_v25  ;;  %v2861_v5 = vrot.slane %v2847_v41, %v6283_v14  ;;  %v2811_v9 = vcombine.high %v2793_v62, %v5797_v25  ;;  %v2862_v59 = vcombine.low %v2829_v10, %v2845_v7 }
 0x54e   : > { %3050 = vxpose.xlu0.c.b16.start.end [1/1] (short) (narrow) %v2810_v52, 16  ;;  %v2802_v15 = vrot.slane %v2794_v3, %v6283_v14  ;;  %v2795_v18 = vcombine.high %v2761_v60, %v2777_v22  ;;  %v2863_v20 = vcombine.high %v2829_v10, %v2845_v7  ;;  %v2990_v58 = vrot.slane %v2982_v23, %v6283_v14 }
 0x54f   : > { %v2879_v12 = vcombine.high %v2861_v5, %v5797_v25  ;;  %v2870_v16 = vrot.slane %v2862_v59, %v6283_v14  ;;  %v2938_v31 = vrot.slane %v2930_v40, %v6283_v14  ;;  %v3013_v54 = vrot.slane %v2999_v4, %v6283_v14 }
 0x550   : > { %v2812_v17 = vcombine.high %v2802_v15, %v5797_v25  ;;  %v2809_v47 = vrot.slane %v2795_v18, %v6283_v14  ;;  %v2877_v37 = vrot.slane %v2863_v20, %v6283_v14 }
 0x551   : > { %3066 = vxpose.xlu1.c.b16.start.end [1/1] (short) (narrow) %v2878_v61, 16  ;;  %v2880_v19 = vcombine.high %v2870_v16, %v5797_v25  ;;  %v2922_v61 = vrot.slane %v2914_v24, %v6283_v14  ;;  %v2948_v32 = vcombine.high %v2938_v31, %v5797_v25 }
 0x552   : > { %3082 = vxpose.xlu0.c.b16.start.end [1/1] (short) (narrow) %v2793_v62, 16  ;;  %v2813_v6 = vcombine.high %v2809_v47, %v5797_v25  ;;  %v2881_v38 = vcombine.high %v2877_v37, %v5797_v25 }
 0x555   : > { %3098 = vxpose.xlu1.c.b16.start.end [1/1] (short) (narrow) %v2861_v5, 16 }
 0x556   : > { %3114 = vxpose.xlu0.c.b16.start.end [1/1] (short) (narrow) %v2811_v9, 16 }
 0x559   : > { %3130 = vxpose.xlu1.c.b16.start.end [1/1] (short) (narrow) %v2879_v12, 16 }
 0x55a   : > { %3146 = vxpose.xlu0.c.b16.start.end [1/1] (short) (narrow) %v2802_v15, 16 }
 0x55d   : > { %3162 = vxpose.xlu1.c.b16.start.end [1/1] (short) (narrow) %v2870_v16, 16 }
 0x55e   : > { %3178 = vxpose.xlu0.c.b16.start.end [1/1] (short) (narrow) %v2812_v17, 16 }
 0x561   : > { %3194 = vxpose.xlu1.c.b16.start.end [1/1] (short) (narrow) %v2880_v19, 16 }
 0x562   : > { %3210 = vxpose.xlu0.c.b16.start.end [1/1] (short) (narrow) %v2809_v47, 16 }
 0x565   : > { %3226 = vxpose.xlu1.c.b16.start.end [1/1] (short) (narrow) %v2877_v37, 16 }
 0x566   : > { %3242 = vxpose.xlu0.c.b16.start.end [1/1] (short) (narrow) %v2813_v6, 16 }
 0x569   : > { %3258 = vxpose.xlu1.c.b16.start.end [1/1] (short) (narrow) %v2881_v38, 16 }
 0x56f   : > { %v6621_v45 = vpop.f32.mrf.mxu1 }
 0x570   : > { %v2506_v34 = vsel %vm2505_vm2, %v6621_v45, -inf }
 0x571   : > { %v5062_v39 = vpop.f32.mrf.mxu1 }
 0x573   : > { %v2373_v43 = vpop.f32.mrf.mxu1 }
 0x575   : > { %v5063_v46 = vpop.f32.mrf.mxu1 }
 0x576   : > { %2507 = vmax.xlane.f32.xlu1 %v2506_v34 }
 0x577   : > { %v6625_v30 = vpop.f32.mrf.mxu1 }
 0x578   : > { %v2509_v33 = vsel %vm2505_vm2, %v6625_v30, -inf }
 0x579   : > { %v5070_v35 = vpop.f32.mrf.mxu1  ;;  %2510 = vmax.xlane.f32.xlu0 %v2509_v33 }
 0x57b   : > { %v2416_v50 = vpop.f32.mrf.mxu1 }
 0x57d   : > { %v5071_v36 = vpop.f32.mrf.mxu1 }
 0x57f   : > { %v6629_v55 = vpop.f32.mrf.mxu1 }
 0x580   : > { %v2512_v62 = vsel %vm2505_vm2, %v6629_v55, -inf }
 0x581   : > { %v5078_v26 = vpop.f32.mrf.mxu1 }
 0x583   : > { %v2459_v13 = vpop.f32.mrf.mxu1 }
 0x585   : > { %v5079_v42 = vpop.f32.mrf.mxu1 }
 0x587   : > { %v6631_v48 = vpop.f32.mrf.mxu1 }
 0x588   : > { %v2515_v60 = vsel %vm2505_vm2, %v6631_v48, -inf }
 0x589   : > { %v5086_v52 = vpop.f32.mrf.mxu1 }
 0x58b   : > { %v2502_v11 = vpop.f32.mrf.mxu1 }
 0x58d   : > { %v5087_v56 = vpop.f32.mrf.mxu1 }
 0x5a3   : > { %3290 = vxpose.xlu1.c.b16.start.end [1/1] (short) (narrow) %v2990_v58, 16 }
 0x5a6   : > { %3274 = vxpose.xlu0.c.b16.start.end [1/1] (short) (narrow) %v2922_v61, 16 }
 0x5ac   : > { %v3026_v41 = vpop.trf.xlu0 }
 0x5af   : > { %v3042_v22 = vpop.trf.xlu1 }
 0x5b0   : > { %2513 = vmax.xlane.f32.xlu1 %v2512_v62  ;;  %v3058_v27 = vpop.trf.xlu0 }
 0x5b3   : > { %2516 = vmax.xlane.f32.xlu0 %v2515_v60  ;;  %v3074_v5 = vpop.trf.xlu1 }
 0x5b4   : > { %v3090_v23 = vpop.trf.xlu0 }
 0x5b5   : > { %v3530_v59 = vcombine.low %v3026_v41, %v3090_v23 }
 0x5b7   : > { %v3106_v7 = vpop.trf.xlu1  ;;  %v3537_v20 = vrot.slane %v3530_v59, %v6280_v8 }
 0x5b8   : > { %v3122_v9 = vpop.trf.xlu0  ;;  %v3580_v17 = vcombine.low %v3042_v22, %v3106_v7 }
 0x5b9   : > { %v3538_v15 = vcombine.low %v3058_v27, %v3122_v9 }
 0x5ba   : > { %v3587_v38 = vrot.slane %v3580_v17, %v6280_v8  ;;  %v3014_v17 = vcombine.high %v2990_v58, %v5797_v25 }
 0x5bb   : > { %v3138_v3 = vpop.trf.xlu1  ;;  %v3545_v47 = vrot.slane %v3538_v15, %v6280_v8 }
 0x5bc   : > { %v3154_v10 = vpop.trf.xlu0  ;;  %v3588_v18 = vcombine.low %v3074_v5, %v3138_v3 }
 0x5bd   : > { %v3562_v34 = vcombine.low %v3537_v20, %v3545_v47  ;;  %v2929_v20 = vrot.slane %v2915_v29, %v6283_v14 }
 0x5be   : > { %v3595_v39 = vrot.slane %v3588_v18, %v6280_v8  ;;  %v2946_v18 = vcombine.high %v2922_v61, %v5797_v25  ;;  %v3006_v61 = vrot.slane %v2998_v49, %v6283_v14 }
 0x5bf   : > { %v3170_v12 = vpop.trf.xlu1  ;;  %v3569_v52 = vrot.slane %v3562_v34, %v6283_v14  ;;  %v2947_v58 = vcombine.high %v2929_v20, %v5797_v25 }
 0x5c0   : > { %v3186_v24 = vpop.trf.xlu0  ;;  %v3612_v26 = vcombine.low %v3587_v38, %v3595_v39  ;;  %v3016_v28 = vcombine.high %v3006_v61, %v5797_v25 }
 0x5c2   : > { %v3619_v62 = vrot.slane %v3612_v26, %v6283_v14 }
 0x5c3   : > { %v3202_v16 = vpop.trf.xlu1 }
 0x5c4   : > { %v3218_v19 = vpop.trf.xlu0 }
 0x5c5   : > { %v3546_v37 = vcombine.low %v3154_v10, %v3218_v19  ;;  %v2997_v19 = vrot.slane %v2983_v53, %v6283_v14  ;;  %v2945_v53 = vrot.slane %v2931_v0, %v6283_v14 }
 0x5c7   : > { %v3234_v6 = vpop.trf.xlu1  ;;  %v3553_v33 = vrot.slane %v3546_v37, %v6280_v8  ;;  %v3015_v47 = vcombine.high %v2997_v19, %v5797_v25 }
 0x5c8   : > { %v3596_v43 = vcombine.low %v3170_v12, %v3234_v6  ;;  %v3250_v46 = vpop.trf.xlu0 }
 0x5c9   : > { %v3554_v35 = vcombine.low %v3186_v24, %v3250_v46 }
 0x5ca   : > { %v3603_v13 = vrot.slane %v3596_v43, %v6280_v8 }
 0x5cb   : > { %v3266_v50 = vpop.trf.xlu1  ;;  %v3561_v36 = vrot.slane %v3554_v35, %v6280_v8 }
 0x5cc   : > { %v3604_v42 = vcombine.low %v3202_v16, %v3266_v50 }
 0x5cd   : > { %v3570_v11 = vcombine.low %v3553_v33, %v3561_v36 }
 0x5ce   : > { %v3611_v56 = vrot.slane %v3604_v42, %v6280_v8 }
 0x5cf   : > { %v3577_v41 = vrot.slane %v3570_v11, %v6283_v14 }
 0x5d0   : > { %v3620_v22 = vcombine.low %v3603_v13, %v3611_v56 }
 0x5d1   : > { %v3578_v27 = vcombine.low %v3569_v52, %v3577_v41  ;;  %v6656_v60 = vcombine.high %v3569_v52, %v3577_v41 }
 0x5d2   : > { %v3627_v5 = vrot.slane %v3620_v22, %v6283_v14 }
 0x5d3   : > { %v3733_v9 = vshrl.u32 %v3578_v27, 16  ;;  %v3739_v3 = vshrl.u32 %v6656_v60, 16 }
 0x5d4   : > { %v3628_v23 = vcombine.low %v3619_v62, %v3627_v5  ;;  %v6659_v7 = vcombine.high %v3619_v62, %v3627_v5 }
 0x5d6   : > { %v3732_v10 = vpack.i.b16 %v3628_v23, %v3578_v27  ;;  %v3734_v12 = vshrl.u32 %v3628_v23, 16  ;;  %v3738_v24 = vpack.i.b16 %v6659_v7, %v6656_v60  ;;  %v3740_v59 = vshrl.u32 %v6659_v7, 16 }
 0x5d8   : > { %5090 = vmatprep.mubr.msk.bf16.mxu0 %vm2505_vm2, %v3732_v10  ;;  %v3735_v15 = vpack.i.b16 %v3734_v12, %v3733_v9  ;;  %v6666_v16 = vpack.i.b16 %v3740_v59, %v3739_v3  ;;  %v2949_v10 = vcombine.high %v2945_v53, %v5797_v25  ;;  %v3017_v12 = vcombine.high %v3013_v54, %v5797_v25 }
 0x5da   : > { %5096 = vmatprep.mubr.msk.bf16.mxu1 %vm2505_vm2, %v3735_v15 }
 0x5dd   : > { %3322 = vxpose.xlu1.c.b16.start.end [1/1] (short) (narrow) %v3014_v17, 16 }
 0x5e0   : > { %3306 = vxpose.xlu0.c.b16.start.end [1/1] (short) (narrow) %v2946_v18, 16 }
 0x5e1   : > { %3354 = vxpose.xlu1.c.b16.start.end [1/1] (short) (narrow) %v2997_v19, 16 }
 0x5e4   : > { %3338 = vxpose.xlu0.c.b16.start.end [1/1] (short) (narrow) %v2929_v20, 16 }
 0x5e5   : > { %3386 = vxpose.xlu1.c.b16.start.end [1/1] (short) (narrow) %v3015_v47, 16 }
 0x5e8   : > { %3370 = vxpose.xlu0.c.b16.start.end [1/1] (short) (narrow) %v2947_v58, 16 }
 0x5e9   : > { %3418 = vxpose.xlu1.c.b16.start.end [1/1] (short) (narrow) %v3006_v61, 16 }
 0x5ec   : > { %3402 = vxpose.xlu0.c.b16.start.end [1/1] (short) (narrow) %v2938_v31, 16 }
 0x5ed   : > { %3450 = vxpose.xlu1.c.b16.start.end [1/1] (short) (narrow) %v3016_v28, 16 }
 0x5f0   : > { %3434 = vxpose.xlu0.c.b16.start.end [1/1] (short) (narrow) %v2948_v32, 16 }
 0x5f1   : > { %3482 = vxpose.xlu1.c.b16.start.end [1/1] (short) (narrow) %v3013_v54, 16 }
 0x5f4   : > { %3466 = vxpose.xlu0.c.b16.start.end [1/1] (short) (narrow) %v2945_v53, 16 }
 0x5ff   : > { %v2508_v29 = vpop.xlane.xlu1 %2507 }
 0x600   : > { %v2518_v49 = vsub.f32 %v6621_v45, %v2508_v29 }
 0x602   : > { %v2522_v40 = vmul.f32 1.442695, %v2518_v49  ;;  %v2511_v37 = vpop.xlane.xlu0 %2510 }
 0x603   : > { %v2519_v6 = vsub.f32 %v6625_v30, %v2511_v37 }
 0x604   : > { %5403 = vpow2.f32 %v2522_v40 }
 0x605   : > { %v2524_v38 = vmul.f32 1.442695, %v2519_v6  ;;  %v3298_v63 = vpop.trf.xlu1 }
 0x607   : > { %5405 = vpow2.f32 %v2524_v38 }
 0x608   : > { %v3282_v57 = vpop.trf.xlu0 }
 0x611   : > { %v5404_v44 = vpop.eup %5403 }
 0x612   : > { %v2530_v51 = vsel %vm2505_vm2, %v5404_v44, 0.0 }
 0x613   : > { %2531 = vadd.xlane.f32.xlu0 %v2530_v51 }
 0x614   : > { %v5406_v4 = vpop.eup %5405 }
 0x615   : > { %v2533_v39 = vsel %vm2505_vm2, %v5406_v4, 0.0 }
 0x616   : > { %2534 = vadd.xlane.f32.xlu1 %v2533_v39 }
 0x639   : > { %v2514_v0 = vpop.xlane.xlu1 %2513 }
 0x63a   : > { %v2520_v45 = vsub.f32 %v6629_v55, %v2514_v0 }
 0x63c   : > { %v2526_v43 = vmul.f32 1.442695, %v2520_v45  ;;  %v2517_v46 = vpop.xlane.xlu0 %2516 }
 0x63d   : > { %v2521_v30 = vsub.f32 %v6631_v48, %v2517_v46 }
 0x63e   : > { %5407 = vpow2.f32 %v2526_v43 }
 0x63f   : > { %v2528_v34 = vmul.f32 1.442695, %v2521_v30  ;;  %v3330_v33 = vpop.trf.xlu1 }
 0x641   : > { %5409 = vpow2.f32 %v2528_v34 }
 0x642   : > { %v3314_v35 = vpop.trf.xlu0 }
 0x643   : > { %v3362_v50 = vpop.trf.xlu1 }
 0x644   : > { %v3680_v36 = vcombine.low %v3298_v63, %v3362_v50 }
 0x646   : > { %v3346_v26 = vpop.trf.xlu0  ;;  %v6706_v11 = vrot.slane %v3680_v36, %v6280_v8 }
 0x647   : > { %v3394_v13 = vpop.trf.xlu1  ;;  %v3630_v42 = vcombine.low %v3282_v57, %v3346_v26 }
 0x648   : > { %v3688_v52 = vcombine.low %v3330_v33, %v3394_v13 }
 0x649   : > { %v3637_v27 = vrot.slane %v3630_v42, %v6280_v8 }
 0x64a   : > { %v3695_v55 = vrot.slane %v3688_v52, %v6280_v8  ;;  %v3378_v56 = vpop.trf.xlu0 }
 0x64b   : > { %v5408_v41 = vpop.eup %5407  ;;  %v3638_v62 = vcombine.low %v3314_v35, %v3378_v56  ;;  %v3426_v15 = vpop.trf.xlu1 }
 0x64c   : > { %v3712_v48 = vcombine.low %v6706_v11, %v3695_v55  ;;  %v2536_v22 = vsel %vm2505_vm2, %v5408_v41, 0.0 }
 0x64d   : > { %v3645_v5 = vrot.slane %v3638_v62, %v6280_v8  ;;  %2537 = vadd.xlane.f32.xlu0 %v2536_v22 }
 0x64e   : > { %v5410_v23 = vpop.eup %5409  ;;  %v3410_v59 = vpop.trf.xlu0  ;;  %v3719_v36 = vrot.slane %v3712_v48, %v6283_v14 }
 0x64f   : > { %v3662_v9 = vcombine.low %v3637_v27, %v3645_v5  ;;  %v2539_v3 = vsel %vm2505_vm2, %v5410_v23, 0.0  ;;  %v3458_v18 = vpop.trf.xlu1 }
 0x650   : > { %2540 = vadd.xlane.f32.xlu1 %v2539_v3 }
 0x651   : > { %v3669_v43 = vrot.slane %v3662_v9, %v6283_v14 }
 0x652   : > { %v3442_v17 = vpop.trf.xlu0 }
 0x653   : > { %v3490_v20 = vpop.trf.xlu1 }
 0x656   : > { %v3474_v19 = vpop.trf.xlu0 }
 0x657   : > { %v3646_v37 = vcombine.low %v3410_v59, %v3474_v19 }
 0x659   : > { %v3653_v51 = vrot.slane %v3646_v37, %v6280_v8 }
 0x67a   : > { %3498 = vxpose.xlu0.c.b16.start.end [1/1] (short) (narrow) %v2949_v10, 16 }
 0x67d   : > { %3514 = vxpose.xlu1.c.b16.start.end [1/1] (short) (narrow) %v3017_v12, 16 }
 0x69c   : > { %v2532_v47 = vpop.xlane.xlu0 %2531 }
 0x69d   : > { %5411 = vrcp.f32 %v2532_v47 }
 0x69f   : > { %v2535_v58 = vpop.xlane.xlu1 %2534 }
 0x6a0   : > { %5413 = vrcp.f32 %v2535_v58 }
 0x6aa   : > { %v5412_v61 = vpop.eup %5411 }
 0x6ab   : > { %v2546_v31 = vmul.f32 %v5412_v61, %v5404_v44  ;;  %v3696_v44 = vcombine.low %v3426_v15, %v3490_v20 }
 0x6ad   : > { %v5414_v28 = vpop.eup %5413  ;;  %v2550_v32 = vpack.c.bf16 %v2546_v31, %v2546_v31  ;;  %v3703_v0 = vrot.slane %v3696_v44, %v6280_v8 }
 0x6ae   : > { %v2547_v29 = vmul.f32 %v5414_v28, %v5406_v4 }
 0x6af   : > { %5172 = vmatprep.subr.msk.bf16.mxu0 %vm2505_vm2, %v2550_v32  ;;  %v3761_v25 = vsel %vm2505_vm2, %v2550_v32, 0  ;;  %v5393_v32 = vld [vmem:[%s6187_s26 + $0x38] sm:$0xff]  }
 0x6b0   : > { %5089 = vmatpush3.bf16.xpose.msra.mxu0 %v3761_v25  ;;  %v2551_v54 = vpack.c.bf16 %v2547_v29, %v2547_v29  ;;  %v5394_v29 = vld [vmem:[%s6187_s26 + $0x30] sm:$0xff]   ;;  %v5395_v25 = vld [vmem:[%s6187_s26 + $0x28] sm:$0xff]  }
 0x6b2   : > { %5173 = vmatprep.subr.msk.bf16.mxu1 %vm2505_vm2, %v2551_v54  ;;  %v3819_v53 = vsel %vm2505_vm2, %v2551_v54, 0  ;;  %v5396_v54 = vld [vmem:[%s6187_s26 + $0x20] sm:$0xff]  }
 0x6b3   : > { %5095 = vmatpush3.bf16.xpose.msra.mxu1 %v3819_v53  ;;  %v5397_v53 = vld [vmem:[%s6187_s26 + $0x18] sm:$0xff]  }
 0x6d6   : > { %v2538_v49 = vpop.xlane.xlu0 %2537 }
 0x6d7   : > { %5415 = vrcp.f32 %v2538_v49  ;;  %v5398_v49 = vld [vmem:[%s6187_s26 + $0x10] sm:$0xff]  }
 0x6d9   : > { %v2541_v40 = vpop.xlane.xlu1 %2540 }
 0x6da   : > { %5417 = vrcp.f32 %v2541_v40 }
 0x6dc   : > { %v3506_v6 = vpop.trf.xlu0 }
 0x6dd   : > { %v3654_v38 = vcombine.low %v3442_v17, %v3506_v6 }
 0x6df   : > { %v3661_v4 = vrot.slane %v3654_v38, %v6280_v8  ;;  %v3522_v39 = vpop.trf.xlu1 }
 0x6e0   : > { %v3704_v63 = vcombine.low %v3458_v18, %v3522_v39 }
 0x6e1   : > { %v3670_v57 = vcombine.low %v3653_v51, %v3661_v4 }
 0x6e2   : > { %v3711_v45 = vrot.slane %v3704_v63, %v6280_v8 }
 0x6e3   : > { %v3677_v46 = vrot.slane %v3670_v57, %v6283_v14 }
 0x6e4   : > { %v5416_v30 = vpop.eup %5415  ;;  %v3720_v34 = vcombine.low %v3703_v0, %v3711_v45 }
 0x6e5   : > { %v3678_v33 = vcombine.low %v3669_v43, %v3677_v46  ;;  %v3679_v35 = vcombine.high %v3669_v43, %v3677_v46  ;;  %v2548_v50 = vmul.f32 %v5416_v30, %v5408_v41 }
 0x6e6   : > { %v3727_v26 = vrot.slane %v3720_v34, %v6283_v14 }
 0x6e7   : > { %v5418_v13 = vpop.eup %5417  ;;  %v2552_v42 = vpack.c.bf16 %v2548_v50, %v2548_v50  ;;  %v3745_v56 = vshrl.u32 %v3678_v33, 16  ;;  %v3751_v62 = vshrl.u32 %v3679_v35, 16 }
 0x6e8   : > { %v3728_v52 = vcombine.low %v3719_v36, %v3727_v26  ;;  %v3729_v11 = vcombine.high %v3719_v36, %v3727_v26  ;;  %v2549_v55 = vmul.f32 %v5418_v13, %v5410_v23 }
 0x6e9   : > { %5174 = vmatprep.subr.msk.bf16.mxu0 %vm2505_vm2, %v2552_v42  ;;  %v3877_v41 = vsel %vm2505_vm2, %v2552_v42, 0 }
 0x6ea   : > { %v3744_v22 = vpack.i.b16 %v3728_v52, %v3678_v33  ;;  %v3746_v27 = vshrl.u32 %v3728_v52, 16  ;;  %v3750_v5 = vpack.i.b16 %v3729_v11, %v3679_v35  ;;  %v3752_v9 = vshrl.u32 %v3729_v11, 16  ;;  %v5399_v33 = vld [vmem:[%s6187_s26 + $0x8] sm:$0xff]  }
 0x6eb   : > { %v2553_v3 = vpack.c.bf16 %v2549_v55, %v2549_v55 }
 0x6ec   : > { %5091 = vmatmul.mubr.msk.bf16.vlgmr.msra.gmra.mxu0 %vm2505_vm2, %v3744_v22  ;;  %v3747_v48 = vpack.i.b16 %v3746_v27, %v3745_v56  ;;  %v3753_v10 = vpack.i.b16 %v3752_v9, %v3751_v62  ;;  %v5400_v27 = vld [vmem:[%s6187_s26] sm:$0xff]  }
 0x6ed   : > { %5101 = vmatpush3.bf16.xpose.msra.mxu0 %v3877_v41  ;;  %5175 = vmatprep.subr.msk.bf16.mxu1 %vm2505_vm2, %v2553_v3  ;;  %v3935_v23 = vsel %vm2505_vm2, %v2553_v3, 0 }
 0x6ee   : > { %5102 = vmatprep.mubr.msk.bf16.mxu0 %vm2505_vm2, %v3738_v24  ;;  %5097 = vmatmul.mubr.msk.bf16.vlgmr.msra.gmra.mxu1 %vm2505_vm2, %v3747_v48 }
 0x6ef   : > { %5107 = vmatpush3.bf16.xpose.msra.mxu1 %v3935_v23  ;;  %5108 = vmatprep.mubr.msk.bf16.mxu1 %vm2505_vm2, %v6666_v16 }
 0x6f0   : > { %5112 = vmatprep.subr.bf16.mxu0 %v6520_v21 }
 0x6f4   : > { %5103 = vmatmul.mubr.msk.bf16.vlgmr.msra.gmra.mxu0 %vm2505_vm2, %v3750_v5 }
 0x6f5   : > { %5128 = vmatprep.mubr.msk.bf16.mxu0 %vm5798_vm0, %v6520_v21  ;;  %5113 = vmatpush3.bf16.msra.mxu0 %v5393_v32 }
 0x6f6   : > { %5109 = vmatmul.mubr.msk.bf16.vlgmr.msra.gmra.mxu1 %vm2505_vm2, %v3753_v10  ;;  %5114 = vmatprep.subr.bf16.mxu0 %v6520_v21 }
 0x6f9   : > { %5115 = vmatpush3.bf16.msra.mxu0 %v5394_v29 }
 0x6fa   : > { %5116 = vmatprep.subr.bf16.mxu0 %v6520_v21 }
 0x6fd   : > { %5117 = vmatpush3.bf16.msra.mxu0 %v5395_v25 }
 0x6fe   : > { %5118 = vmatprep.subr.bf16.mxu0 %v6520_v21 }
 0x701   : > { %5119 = vmatpush3.bf16.msra.mxu0 %v5396_v54 }
 0x702   : > { %5120 = vmatprep.subr.bf16.mxu0 %v6520_v21 }
 0x705   : > { %5121 = vmatpush3.bf16.msra.mxu0 %v5397_v53 }
 0x706   : > { %5122 = vmatprep.subr.bf16.mxu0 %v6520_v21 }
 0x709   : > { %5123 = vmatpush3.bf16.msra.mxu0 %v5398_v49 }
 0x70a   : > { %5124 = vmatprep.subr.bf16.mxu0 %v6520_v21 }
 0x70d   : > { %5125 = vmatpush3.bf16.msra.mxu0 %v5399_v33 }
 0x70e   : > { %5126 = vmatprep.subr.bf16.mxu0 %v6520_v21 }
 0x711   : > { %5127 = vmatpush3.bf16.msra.mxu0 %v5400_v27 }
 0x7ac   : > { %v5092_v12 = vpop.f32.mrf.mxu0 }
 0x7ae   : > { %v3797_v59 = vpop.f32.mrf.mxu0  ;;  %v5098_v60 = vpop.f32.mrf.mxu1 }
 0x7af   : > { %3986 = vxpose.xlu0.b32.start [1/4] (short) (narrow) %v3797_v59, 8 }
 0x7b0   : > { %v5093_v7 = vpop.f32.mrf.mxu0  ;;  %v3855_v24 = vpop.f32.mrf.mxu1 }
 0x7b1   : > { %4018 = vxpose.xlu1.b32.start [1/4] (short) (narrow) %v3855_v24, 8 }
 0x7b2   : > { %v3800_v15 = vpop.f32.mrf.mxu0  ;;  %v5099_v17 = vpop.f32.mrf.mxu1 }
 0x7b3   : > { %3987 = vxpose.xlu0.b32.cont [2/4] (short) (narrow) %v3800_v15, 8 }
 0x7b4   : > { %v3858_v16 = vpop.f32.mrf.mxu1  ;;  %v5104_v18 = vpop.f32.mrf.mxu0 }
 0x7b5   : > { %4019 = vxpose.xlu1.b32.cont [2/4] (short) (narrow) %v3858_v16, 8 }
 0x7b6   : > { %v5110_v19 = vpop.f32.mrf.mxu1  ;;  %v3913_v20 = vpop.f32.mrf.mxu0 }
 0x7b7   : > { %3988 = vxpose.xlu0.b32.cont [3/4] (short) (narrow) %v5092_v12, 8 }
 0x7b8   : > { %v3971_v47 = vpop.f32.mrf.mxu1  ;;  %v5105_v58 = vpop.f32.mrf.mxu0 }
 0x7b9   : > { %4020 = vxpose.xlu1.b32.cont [3/4] (short) (narrow) %v5098_v60, 8 }
 0x7ba   : > { %v5111_v61 = vpop.f32.mrf.mxu1  ;;  %v3916_v31 = vpop.f32.mrf.mxu0 }
 0x7bb   : > { %3989 = vxpose.xlu0.b32.end [4/4] (short) (narrow) %v5093_v7, 8 }
 0x7bc   : > { %v3974_v28 = vpop.f32.mrf.mxu1 }
 0x7bd   : > { %4021 = vxpose.xlu1.b32.end [4/4] (short) (narrow) %v5099_v17, 8 }
 0x7bf   : > { %4050 = vxpose.xlu0.b32.start [1/4] (short) (narrow) %v3913_v20, 8 }
 0x7c1   : > { %4082 = vxpose.xlu1.b32.start [1/4] (short) (narrow) %v3971_v47, 8 }
 0x7c3   : > { %4051 = vxpose.xlu0.b32.cont [2/4] (short) (narrow) %v3916_v31, 8 }
 0x7c5   : > { %4083 = vxpose.xlu1.b32.cont [2/4] (short) (narrow) %v3974_v28, 8 }
 0x7c7   : > { %4052 = vxpose.xlu0.b32.cont [3/4] (short) (narrow) %v5104_v18, 8 }
 0x7c9   : > { %4084 = vxpose.xlu1.b32.cont [3/4] (short) (narrow) %v5110_v19, 8  ;;  %v531_v19 = vld [vmem:[%s6197_s23 + $0x2] ss:$0 sm:$0xff] }
 0x7cb   : > { %4053 = vxpose.xlu0.b32.end [4/4] (short) (narrow) %v5105_v58, 8 }
 0x7cd   : > { %4085 = vxpose.xlu1.b32.end [4/4] (short) (narrow) %v5111_v61, 8  ;;  %v5420_v61 = vld [vmem:[%s6205_s7] sm:$0xff] }
 0x82b   : > { %v4002_v40 = vpop.trf.xlu0 }
 0x82d   : > { %v4034_v37 = vpop.trf.xlu1 }
 0x83b   : > { %v4066_v6 = vpop.trf.xlu0 }
 0x83c   : > { %v4114_v38 = vcombine.low %v4002_v40, %v4066_v6  ;;  %v4115_v44 = vcombine.high %v4002_v40, %v4066_v6 }
 0x83d   : > { %v4098_v51 = vpop.trf.xlu1 }
 0x83e   : > { %v4130_v4 = vcombine.low %v4034_v37, %v4098_v51  ;;  %v4131_v39 = vcombine.high %v4034_v37, %v4098_v51  ;;  %v4122_v63 = vrot.slane %v4114_v38, %v6280_v8  ;;  %v4129_v57 = vrot.slane %v4115_v44, %v6280_v8 }
 0x840   : > { %v4138_v0 = vrot.slane %v4130_v4, %v6280_v8  ;;  %v4145_v45 = vrot.slane %v4131_v39, %v6280_v8 }
 0x842   : > { %v4146_v43 = vcombine.low %v4122_v63, %v4138_v0  ;;  %v4147_v46 = vcombine.high %v4122_v63, %v4138_v0  ;;  %v4162_v30 = vcombine.low %v4129_v57, %v4145_v45  ;;  %v4163_v34 = vcombine.high %v4129_v57, %v4145_v45 }
 0x844   : > { %v4154_v35 = vrot.slane %v4146_v43, %v6283_v14  ;;  %v4161_v50 = vrot.slane %v4147_v46, %v6283_v14  ;;  %v4170_v36 = vrot.slane %v4162_v30, %v6283_v14  ;;  %v4177_v26 = vrot.slane %v4163_v34, %v6283_v14 }
 0x846   : > { %v4182_v13 = vcombine.low %v4154_v35, %v4161_v50  ;;  %v4939_v42 = vcombine.high %v4154_v35, %v4161_v50  ;;  %v4198_v52 = vcombine.low %v4170_v36, %v4177_v26  ;;  %v4940_v11 = vcombine.high %v4170_v36, %v4177_v26 }
 0x848   : > { %v4189_v55 = vrot.slane %v4182_v13, %v6280_v8  ;;  %v4197_v56 = vrot.slane %v4939_v42, %v6280_v8  ;;  %v4205_v62 = vrot.slane %v4198_v52, %v6280_v8  ;;  %v4213_v22 = vrot.slane %v4940_v11, %v6280_v8 }
 0x84a   : > { %v4215_v5 = vcombine.high %v4189_v55, %v4197_v56  ;;  %v4231_v9 = vcombine.high %v4205_v62, %v4213_v22  ;;  %v4214_v3 = vcombine.low %v4189_v55, %v4197_v56  ;;  %v4230_v41 = vcombine.low %v4205_v62, %v4213_v22 }
 0x84c   : > { %v4229_v48 = vrot.slane %v4215_v5, %v6283_v14  ;;  %v4245_v10 = vrot.slane %v4231_v9, %v6283_v14  ;;  %v4222_v21 = vrot.slane %v4214_v3, %v6283_v14  ;;  %v4238_v23 = vrot.slane %v4230_v41, %v6283_v14 }
 0x84e   : > { %v4248_v12 = vcombine.low %v4229_v48, %v4245_v10  ;;  %v4247_v59 = vcombine.high %v4222_v21, %v4238_v23  ;;  %v4246_v60 = vcombine.low %v4222_v21, %v4238_v23  ;;  %v4249_v8 = vcombine.high %v4229_v48, %v4245_v10 }
 0x850   : > { %4255 = vrot.lane.b32.xlu1 %v4248_v12, %s5801_s21  ;;  %4251 = vrot.lane.b32.xlu0 %v4247_v59, %s5799_s2 }
 0x854   : > { %4259 = vrot.lane.b32.xlu1 %v4249_v8, %s5800_s28 }
 0x8c2   : > { %v4256_v7 = vpop.permute.xlu1 %4255  ;;  %v4252_v24 = vpop.permute.xlu0 %4251 }
 0x8c3   : > { %v4262_v15 = vsel %vm2332_vm1, %v4246_v60, %v4252_v24 }
 0x8c4   : > { %v4264_v14 = vsel %vm4263_vm3, %v4262_v15, %v4256_v7 }
 0x8c6   : > { %v4260_v17 = vpop.permute.xlu1 %4259 }
 0x8c7   : > { %v4266_v16 = vsel %vm4265_vm4, %v4264_v14, %v4260_v17 }
 0x8c8   : > { %v4267_v18 = vpack.c.bf16 %v4266_v16, %v4266_v16 }
 0x8ca   : > { %5129 = vmatmul.mubr.bf16.vlgmr.msra.gmra.mxu0 %v4267_v18 }
 0x98a   : > { %v4366_v20 = vpop.f32.mrf.mxu0 }
 0x98b   : > { %v4367_v47 = vadd.f32 %v4366_v20, %v531_v19 }
 0x98c   : > { %v5130_v58 = vpop.f32.mrf.mxu0 }
 0x98d   : > { %v4372_v31 = vadd.f32 %v5420_v61, %v4367_v47 }
 0x98e   : > { %v4369_v28 = vpop.f32.mrf.mxu0 }
 0x98f   : > { %4373 = vst [vmem:[#allocation2] sm:$0xff] %v4372_v31 }
 0x990   : > { %v5131_v32 = vpop.f32.mrf.mxu0 }
 0x991 PF: > { %v5421_v25 = vld [vmem:[%s6189_s18 + $0x38] sm:$0xff]   ;;  %v5804_v54 = vmov 0.0   ;;  %v5422_v53 = vld [vmem:[%s6189_s18 + $0x30] sm:$0xff]   ;;  %v5423_v38 = vld [vmem:[%s6189_s18 + $0x28] sm:$0xff]   ;;  %vm5805_vm5 = vmmov 0   ;;  %s7020_s0 = sld [smem:[#allocation25_spill]] }
 0x992   : > { %5132 = vmatprep.subr.bf16.mxu0 %v5804_v54  ;;  %5152 = vmatprep.subr.bf16.mxu1 %v5804_v54  ;;  %v5424_v44 = vld [vmem:[%s6189_s18 + $0x20] sm:$0xff]   ;;  %v5425_v51 = vld [vmem:[%s6189_s18 + $0x18] sm:$0xff]   ;;  %v5426_v4 = vld [vmem:[%s6189_s18 + $0x10] sm:$0xff]  }
 0x993   : > { %5133 = vmatpush3.bf16.msra.mxu0 %v5421_v25  ;;  %5148 = vmatprep.mubr.msk.bf16.mxu0 %vm5805_vm5, %v5804_v54  ;;  %v5427_v39 = vld [vmem:[%s6189_s18 + $0x8] sm:$0xff]   ;;  %v5428_v63 = vld [vmem:[%s6189_s18] sm:$0xff]   ;;  %v5429_v57 = vld [vmem:[%s6195_s10 + $0x38] sm:$0xff]  }
 0x994   : > { %5134 = vmatprep.subr.bf16.mxu0 %v5804_v54  ;;  %5168 = vmatprep.mubr.msk.bf16.mxu1 %vm5805_vm5, %v5804_v54  ;;  %v5430_v0 = vld [vmem:[%s6195_s10 + $0x30] sm:$0xff]   ;;  %v5431_v36 = vld [vmem:[%s6195_s10 + $0x28] sm:$0xff]   ;;  %v5432_v26 = vld [vmem:[%s6195_s10 + $0x20] sm:$0xff]  }
 0x995   : > { %5153 = vmatpush3.bf16.msra.mxu1 %v5429_v57  ;;  %v5433_v13 = vld [vmem:[%s6195_s10 + $0x18] sm:$0xff]   ;;  %v5434_v42 = vld [vmem:[%s6195_s10 + $0x10] sm:$0xff]   ;;  %v4506_v10 = vld [vmem:[#allocation3] sm:$0xff] }
 0x996   : > { %v4375_v29 = vld [vmem:[#allocation2] sm:$0xff]  ;;  %5154 = vmatprep.subr.bf16.mxu1 %v5804_v54 }
 0x997   : > { %4376 = vadd.xlane.f32.xlu0 %v4375_v29  ;;  %5135 = vmatpush3.bf16.msra.mxu0 %v5422_v53  ;;  %s4949_s20 = sshll.u32 %s7020_s0, 7  ;;  %p4614_p1 = scmp.eq.s32.totalorder %s7020_s0, 3 }
 0x998   : > { %5136 = vmatprep.subr.bf16.mxu0 %v5804_v54  ;;  %s4391_s6 = sshra.s32 %s4949_s20, 7  ;;  %p4967_p12 = scmp.ne.s32.totalorder %s7020_s0, 3 }
 0x999   : > { %5155 = vmatpush3.bf16.msra.mxu1 %v5430_v0  ;;  %s4950_s15 = sshll.u32 %s4391_s6, 3 }
 0x99a   : > { %5156 = vmatprep.subr.bf16.mxu1 %v5804_v54  ;;  %s4394_s5 = scalar_lea.vmem %s6197_s23, %s4950_s15 [#allocation13] }
 0x99b   : > { %5137 = vmatpush3.bf16.msra.mxu0 %v5423_v38  ;;  %v4395_v52 = vld [vmem:[%s4394_s5 + $0x1] ss:$0 sm:$0xff] }
 0x99c   : > { %5138 = vmatprep.subr.bf16.mxu0 %v5804_v54 }
 0x99d   : > { %5157 = vmatpush3.bf16.msra.mxu1 %v5431_v36 }
 0x99e   : > { %5158 = vmatprep.subr.bf16.mxu1 %v5804_v54 }
 0x99f   : > { %5139 = vmatpush3.bf16.msra.mxu0 %v5424_v44 }
 0x9a0   : > { %5140 = vmatprep.subr.bf16.mxu0 %v5804_v54 }
 0x9a1   : > { %5159 = vmatpush3.bf16.msra.mxu1 %v5432_v26 }
 0x9a2   : > { %5160 = vmatprep.subr.bf16.mxu1 %v5804_v54 }
 0x9a3   : > { %5141 = vmatpush3.bf16.msra.mxu0 %v5425_v51 }
 0x9a4   : > { %5142 = vmatprep.subr.bf16.mxu0 %v5804_v54 }
 0x9a5   : > { %5161 = vmatpush3.bf16.msra.mxu1 %v5433_v13 }
 0x9a6   : > { %5162 = vmatprep.subr.bf16.mxu1 %v5804_v54 }
 0x9a7   : > { %5143 = vmatpush3.bf16.msra.mxu0 %v5426_v4 }
 0x9a8   : > { %5144 = vmatprep.subr.bf16.mxu0 %v5804_v54 }
 0x9a9   : > { %5163 = vmatpush3.bf16.msra.mxu1 %v5434_v42 }
 0x9aa   : > { %5164 = vmatprep.subr.bf16.mxu1 %v5804_v54 }
 0x9ab   : > { %5145 = vmatpush3.bf16.msra.mxu0 %v5427_v39 }
 0x9ac   : > { %5146 = vmatprep.subr.bf16.mxu0 %v5804_v54 }
 0x9af   : > { %5147 = vmatpush3.bf16.msra.mxu0 %v5428_v63 }
 0xa20   : > { %v4377_v49 = vpop.xlane.xlu0 %4376 }
 0xa21   : > { %v4379_v40 = vmul.f32 0.0078125, %v4377_v49 }
 0xa23   : > { %v4380_v37 = vsub.f32 %v4375_v29, %v4379_v40 }
 0xa25   : > { %v4381_v6 = vmul.f32 %v4380_v37, %v4380_v37 }
 0xa27   : > { %4382 = vadd.xlane.f32.xlu0 %v4381_v6 }
 0xab0   : > { %v4383_v45 = vpop.xlane.xlu0 %4382 }
 0xab1   : > { %v4384_v43 = vmul.f32 0.0078125, %v4383_v45 }
 0xab3   : > { %v4385_v46 = vadd.f32 1e-05, %v4384_v43 }
 0xab5   : > { %5437 = vrsqrt.f32 %v4385_v46 }
 0xac2   : > { %v5438_v30 = vpop.eup %5437 }
 0xac3   : > { %v4387_v34 = vmul.f32 %v5438_v30, %v4380_v37 }
 0xac5   : > { %v4388_v33 = vmul.f32 %v4387_v34, %v6209_v1  ;;  %v5435_v1 = vld [vmem:[%s6195_s10 + $0x8] sm:$0xff]  }
 0xac6   : > { %5165 = vmatpush3.bf16.msra.mxu1 %v5435_v1 }
 0xac7   : > { %v4389_v35 = vadd.f32 %v4388_v33, %v6212_v2  ;;  %v5436_v2 = vld [vmem:[%s6195_s10] sm:$0xff]   ;;  %5166 = vmatprep.subr.bf16.mxu1 %v5804_v54 }
 0xac9   : > { %v4396_v50 = vpack.c.bf16 %v4389_v35, %v4389_v35 }
 0xaca   : > { %5167 = vmatpush3.bf16.msra.mxu1 %v5436_v2 }
 0xacb   : > { %5149 = vmatmul.mubr.bf16.vlgmr.msra.gmra.mxu0 %v4396_v50 }
 0xb8b   : > { %v4495_v11 = vpop.f32.mrf.mxu0 }
 0xb8c   : > { %v4496_v55 = vadd.f32 %v4495_v11, %v4395_v52 }
 0xb8d   : > { %v5150_v56 = vpop.f32.mrf.mxu0 }
 0xb8e   : > { %v4502_v62 = vmul.f32 0.70710677, %v4496_v55  ;;  %v4501_v9 = vmul.f32 0.5, %v4496_v55 }
 0xb8f   : > { %v4498_v22 = vpop.f32.mrf.mxu0 }
 0xb90   : > { %5439 = verf.f32 %v4502_v62 }
 0xb91   : > { %v5151_v27 = vpop.f32.mrf.mxu0 }
 0xb9d   : > { %v5440_v5 = vpop.eup %5439 }
 0xb9e   : > { %v4504_v3 = vadd.f32 1.0, %v5440_v5 }
 0xba0   : > { %v4505_v41 = vmul.f32 %v4504_v3, %v4501_v9 }
 0xba2   : > { %v4507_v48 = vpack.c.bf16 %v4505_v41, %v4505_v41 }
 0xba4   : > { %5169 = vmatmul.mubr.bf16.vlgmr.msra.gmra.mxu1 %v4507_v48 }
 0xc64   : > { %v4606_v21 = vpop.f32.mrf.mxu1 }
 0xc65   : > { %v4612_v23 = vadd.f32 %v4606_v21, %v4506_v10 }
 0xc66   : > { %v5170_v12 = vpop.f32.mrf.mxu1  ;;  %4617 = sbr.rel (%p4967_p12) target bundleno = 3188 (0xc74), region = 84 }
 0xc67   : > { %4613 = vst [vmem:[#allocation3] sm:$0xff] %v4612_v23 }
 0xc68   : > { %v4609_v59 = vpop.f32.mrf.mxu1 }
 0xc6a   : > { %v5171_v60 = vpop.f32.mrf.mxu1 }
 0xc6b   : > { %v4618_v8 = vld [vmem:[%s6197_s23 + $0x3] ss:$0 sm:$0xff] }
 0xc6c   : > { %v4619_v7 = vld [vmem:[#allocation2] sm:$0xff] }
 0xc6e   : > { %v4620_v24 = vld [vmem:[#allocation3] sm:$0xff] }
 0xc6f   : > { %v4621_v15 = vadd.f32 %v4620_v24, %v4619_v7 }
 0xc71   : > { %v4622_v17 = vadd.f32 %v4621_v15, %v4618_v8 }
 0xc73   : > { %4623 = vst [vmem:[%s6205_s7] sm:$0xff] %v4622_v17 }
 0xc74 PF: > { %s7021_s24 = sld [smem:[#allocation26_spill]] }
 0xc7a   : > { %p4624_p4 = scmp.eq.s32.totalorder %s7021_s24, 1 }
 0xc7c   : > { %p4625_p0 = pnand %p4624_p4, %p4614_p1 }
 0xc7d   : > { %s7023_s26 = sld [smem:[#allocation47_spill]] (!%p4625_p0) }
 0xc7e   : > { %4628 = sbr.rel (%p4625_p0) target bundleno = 3511 (0xdb7), region = 88 }
 0xc83   : > { %v4629_v14 = vld [vmem:[%s6205_s7] sm:$0xff]  ;;  %s7024_s3 = smov %s7023_s26 }
 0xc84   : > { %4632 = vadd.xlane.f32.xlu0 %v4629_v14  ;;  %v4968_v28 = vld [vmem:[%s7023_s26] ss:$0 sm:$0xff]  ;;  %v4969_v29 = vld [vmem:[%s7024_s3 + $0x1] ss:$0 sm:$0xff] }
 0xd0d   : > { %v4633_v16 = vpop.xlane.xlu0 %4632 }
 0xd0e   : > { %v4634_v18 = vmul.f32 0.0078125, %v4633_v16 }
 0xd10   : > { %v4635_v19 = vsub.f32 %v4629_v14, %v4634_v18 }
 0xd12   : > { %v4636_v20 = vmul.f32 %v4635_v19, %v4635_v19 }
 0xd14   : > { %4637 = vadd.xlane.f32.xlu0 %v4636_v20 }
 0xd9d   : > { %v4638_v47 = vpop.xlane.xlu0 %4637 }
 0xd9e   : > { %v4639_v58 = vmul.f32 0.0078125, %v4638_v47 }
 0xda0   : > { %v4640_v61 = vadd.f32 1e-05, %v4639_v58 }
 0xda2   : > { %5441 = vrsqrt.f32 %v4640_v61 }
 0xdaf   : > { %v5442_v31 = vpop.eup %5441 }
 0xdb0   : > { %v4642_v32 = vmul.f32 %v5442_v31, %v4635_v19 }
 0xdb2   : > { %v4647_v25 = vmul.f32 %v4968_v28, %v4642_v32 }
 0xdb4   : > { %v4652_v54 = vadd.f32 %v4969_v29, %v4647_v25 }
 0xdb6   : > { %4653 = vst [vmem:[%s6205_s7] sm:$0xff] %v4652_v54 }
 0xdb7 PF: > { %s7025_s10 = sld [smem:[#allocation27_spill]]  ;;  %s4668_s2 = sshll.u32 %s6205_s7, 4  ;;  %s4669_s2 = int_to_ptr.vmem [resolvable:$true] %s4668_s2 }
 0xdb8   : > { %s7026_s19 = sld [smem:[#allocation48_spill]]  ;;  %s4655_s28 = scalar_lea.sflag [#allocation6], %s6170_s29 }
 0xdb9   : > { %s5611_s21 = scalar_lea.vmem %s4669_s2, 128  ;;  %s5806_s0 = smov [#allocation15]  }
 0xdba   : > { %p5612_p8 = scmp.ne.s32.totalorder %s4669_s2, %s5611_s21  ;;  %s5615_s20 = sshll.u32 %s5806_s0, 4  ;;  %s5616_s20 = int_to_ptr.vmem [resolvable:$false] %s5615_s20 }
 0xdbb   : > { %s5617_s6 = scalar_lea.vmem %s5616_s20, 256  ;;  %p5618_p5 = scmp.lt.s32.totalorder %s4669_s2, %s5616_s20 }
 0xdbc   : > { %p5613_p10 = pnand %p5612_p8, %p6098_p11  ;;  %p5619_p9 = scmp.lt.s32.totalorder %s5617_s6, %s5611_s21 }
 0xdbd   : > { %s4971_s17 = sshll.u32 %s7025_s10, 7 }
 0xdbe   : > { %s4666_s27 = scalar_lea.hbm %s7026_s19, %s4971_s17  ;;  %p5614_p3 = pneg %p5613_p10 }
 0xdbf   : > { %p5620_p13 = por %p5619_p9, %p5618_p5 }
 0xdc1   : > { %p5621_p6 = pnand %p5620_p13, %p5614_p3 }
 0xdc3   : > { %5624 = shalt.err (!%p5621_p6)
}
 0xdc4   : > { %s5625_s15 = scalar_lea.hbm %s4666_s27, 128  ;;  %s5629_s5 = scalar_lea.hbm %s7026_s19, 256 }
 0xdc5   : > { %p5626_p2 = scmp.ne.s32.totalorder %s4666_s27, %s5625_s15  ;;  %p5630_p4 = scmp.lt.s32.totalorder %s4666_s27, %s7026_s19 }
 0xdc6   : > { %p5631_p0 = scmp.lt.s32.totalorder %s5629_s5, %s5625_s15 }
 0xdc7   : > { %p5627_p1 = pnand %p5626_p2, %p6098_p11 }
 0xdc8   : > { %p5632_p8 = por %p5631_p0, %p5630_p4 }
 0xdc9   : > { %p5628_p12 = pneg %p5627_p1 }
 0xdcb   : > { %p5633_p10 = pnand %p5632_p8, %p5628_p12 }
 0xdcd   : > { %5636 = shalt.err (!%p5633_p10)
}
 0xdce   : > { %5191 = dma.vmem_to_hbm [thread:$0]  (%p6098_p11), %s4669_s2, 128, %s4666_s27, %s4655_s28  }
 0xdcf PF: > { %p5217_p3 = scmp.ge.s32.totalorder %s5783_s16, 2  ;;  %s4680_s11 = sand.u32 1, %s5747_s30  }
 0xdd0   : > { %s4681_s26 = scalar_lea.sflag [#allocation6], %s4680_s11 }
 0xdd1   : > { %p5213_p5 = pnand %p5217_p3, %p6107_p7 }
 0xdd3   : > { %p5214_p9 = pneg %p5213_p5 }
 0xdd5   : > { %5718 = dma.done.wait (%p5214_p9), %s4681_s26, 128  }
 0xdd6   : > { %5720 = vsyncadd (%p5214_p9), %s4681_s26, 4294967168  ;;  %s32_s16 = sadd.s32 1, %s5783_s16   ;;  %s7029_s22 = sld [smem:[#allocation21_spill]] }
 0xdd7   : > { %p6858_p13 = scmp.ge.s32.totalorder %s32_s16, 18   ;;  %s7030_s26 = sld [smem:[#allocation39_spill]] }
 0xdd8   : > { %s7031_s27 = sld [smem:[#allocation22_spill]]  ;;  %s7040_s24 = smov %s5727_s25 }
 0xdd9   : > { %s7032_s28 = sld [smem:[#allocation23_spill]]  ;;  %s7042_s30 = smov %s5751_s8 }
 0xdda   : > { %s7033_s29 = sld [smem:[#allocation37_spill]]  ;;  %s7044_s10 = smov %s5771_s13 }
 0xddb   : > { %s7034_s1 = sld [smem:[#allocation24_spill]]  ;;  %s7045_s11 = smov %s5775_s14 }
 0xddc   : > { %s7035_s9 = sld [smem:[#allocation38_spill]]  ;;  %s7041_s25 = smov %s7029_s22 }
 0xddd   : > { %s7036_s12 = sld [smem:[#allocation28_spill]] }
 0xdde   : > { %s7037_s17 = sld [smem:[#allocation31_spill]] }
 0xddf   : > { %s7038_s23 = sld [smem:[#allocation33_spill]] }
 0xde0   : > { %s7039_s15 = sld [smem:[#allocation36_spill]] }
 0xde1   : > { %s7043_s8 = smov %s7034_s1  ;;  %31 = sbr.rel (!%p6858_p13) target bundleno = 26 (0x1a), region = 171 }
 0xde4   : > { %s7046_s13 = smov %s7037_s17 }
 0xde5   : > { %s7047_s14 = smov %s7038_s23 }
 0xde6   :  { %4686 = vsyncpa [#allocation5], 1 }
 0xde7   :  { %4688 = vsyncpa [#allocation5 + $0x1], 1 }
 0xde8   :  { %4689 = vsyncpa [#allocation8], 1 }
 0xde9   :  { %4691 = vsyncpa [#allocation8 + $0x1], 1 }
 0xdea   :  { %4692 = vsyncpa [#allocation11], 1 }
 0xdeb   :  { %4694 = vsyncpa [#allocation11 + $0x1], 1 }
 0xdec   :  { %4695 = vsyncpa [#allocation14], 1 }
 0xded   :  { %4697 = vsyncpa [#allocation14 + $0x1], 1 }
 0xdee   :  { %4698 = vsyncpa [#allocation6], 1 }
 0xdef   :  { %4700 = vsyncpa [#allocation6 + $0x1], 1 }

</bundles_post_ra>
